<compile_context>
chip_gen: v7x
topology: tpu7x:2x2x1
jax: 0.10.0
libtpu: 0.0.40
codegen_flags: <defaults>
</compile_context>

<pallas_src>
import math

import jax
import jax.numpy as jnp
from jax.experimental import pallas as pl
from jax.experimental.pallas import tpu as pltpu

# ---------------- small DistilBERT-like config ----------------
VOCAB      = 128
MAX_POS    = 64
DIM        = 32
N_HEADS    = 2
HEAD_DIM   = DIM // N_HEADS
FFN_DIM    = 64
N_LAYERS   = 2          # DistilBERT has 6; reduced for the small synthetic demo
NUM_LABELS = 5
CLS_PAD    = 128        # classifier lane width padded to a full vreg -> dense store
LN_EPS     = 1e-12


# ---------------- in-kernel helpers ----------------
def _layer_norm(x, g, b):
    mu = jnp.mean(x, axis=-1, keepdims=True)
    var = jnp.mean((x - mu) ** 2, axis=-1, keepdims=True)
    return (x - mu) * jax.lax.rsqrt(var + LN_EPS) * g + b


def _mm(x, w):
    # bf16 MXU operands, f32 accumulation.
    return jnp.dot(x.astype(jnp.bfloat16), w.astype(jnp.bfloat16),
                   preferred_element_type=jnp.float32)


# ---------------- fused whole-model kernel ----------------
# Grid = (B, N_LAYERS); batch axis "parallel", layer axis "arbitrary".
def _fused_forward_kernel(h0_ref, mask_ref, labels_ref, emb_g_ref, emb_b_ref,
                          wqkv_ref, bqkv_ref, wo_ref, bo_ref, sag_ref, sab_ref,
                          wf1_ref, bf1_ref, wf2_ref, bf2_ref, og_ref, ob_ref,
                          clsw_ref, clsb_ref,
                          logits_ref, lnum_ref, lden_ref,
                          h_scr):
    li = pl.program_id(1)
    neg = jnp.finfo(jnp.float32).min

    # ---- embeddings LayerNorm, once per batch row (word+pos gather in wrapper) ----
    @pl.when(li == 0)
    def _():
        h_scr[...] = _layer_norm(h0_ref[0].astype(jnp.float32),
                                 emb_g_ref[...], emb_b_ref[...])

    x = h_scr[...]                                   # (S, D) f32, resident in VMEM
    key_ok = mask_ref[...] > 0.0                     # (1, 1, S) -> broadcasts over (H, S, S)

    # ---- attention: head-batched dot_generals on head-major weights ----
    xb = x.astype(jnp.bfloat16)                      # (S, D)
    x_h = jnp.broadcast_to(xb, (N_HEADS,) + xb.shape)               # (H, S, D)
    # fused head-major QKV projection; 1/sqrt(head_dim) already folded into Q weights
    qkv = jnp.einsum("hsd,hde->hse", x_h, wqkv_ref[0],
                     preferred_element_type=jnp.float32) + bqkv_ref[0]   # (H, S, 3*hd)
    q = qkv[:, :, 0 * HEAD_DIM:1 * HEAD_DIM]                            # (H, S, hd)
    k = qkv[:, :, 1 * HEAD_DIM:2 * HEAD_DIM]
    v = qkv[:, :, 2 * HEAD_DIM:3 * HEAD_DIM]

    scores = jnp.einsum("hqd,hkd->hqk", q.astype(jnp.bfloat16), k.astype(jnp.bfloat16),
                        preferred_element_type=jnp.float32)             # (H, S, S)
    scores = jnp.where(key_ok, scores, neg)          # mask padded keys only (per batch)
    mx = jnp.max(scores, axis=-1, keepdims=True)
    p = jnp.exp(scores - mx)
    probs = p * pl.reciprocal(jnp.sum(p, axis=-1, keepdims=True), approx=True)

    ctx = jnp.einsum("hqk,hkd->hqd", probs.astype(jnp.bfloat16), v.astype(jnp.bfloat16),
                     preferred_element_type=jnp.float32)                # (H, S, hd)
    attn_h = jnp.einsum("hqd,hde->hqe", ctx.astype(jnp.bfloat16), wo_ref[0],
                        preferred_element_type=jnp.float32)             # (H, S, D)
    attn = jnp.sum(attn_h, axis=0) + bo_ref[0]                          # (S, D)

    # residual + LayerNorm
    sa = _layer_norm(attn + x, sag_ref[0], sab_ref[0])

    # FFN (GELU) + residual + LayerNorm
    ff = _mm(sa, wf1_ref[0]) + bf1_ref[0]                               # (S, FFN)
    # TODO(synk): PyTorch nn.GELU defaults to exact erf; tanh approximation used here
    # for Mosaic portability (max abs diff ~1e-3).
    ff = 0.5 * ff * (1.0 + jnp.tanh(0.7978845608028654 * (ff + 0.044715 * ff * ff * ff)))
    ff = _mm(ff, wf2_ref[0]) + bf2_ref[0]                               # (S, D)
    h_new = _layer_norm(ff + sa, og_ref[0], ob_ref[0])
    h_scr[...] = h_new

    # ---- classifier + fused per-batch CE partial sums at the last layer ----
    @pl.when(li == pl.num_programs(1) - 1)
    def _():
        logits = _mm(h_new, clsw_ref[...]) + clsb_ref[...]              # (S, CLS_PAD) f32
        logits_ref[0] = logits.astype(logits_ref.dtype)                 # lane-dense store

        labels = labels_ref[0]                                          # (S, 1) int32
        Sq, C = logits.shape
        cls = jax.lax.broadcasted_iota(jnp.int32, (Sq, C), 1)
        masked = jnp.where(cls < NUM_LABELS, logits, -1e30)             # drop lane padding
        m = jnp.max(masked, axis=-1, keepdims=True)
        sh = masked - m
        lse = jnp.log(jnp.sum(jnp.exp(sh), axis=-1, keepdims=True))
        logp = sh - lse                                                 # log-softmax
        picked = jnp.sum(jnp.where(cls == labels, logp, 0.0), axis=-1, keepdims=True)
        valid = (labels != -100).astype(jnp.float32)                    # ignore_index = -100
        lnum_ref[...] = jnp.broadcast_to(-jnp.sum(picked * valid), (1, 1, 1))
        lden_ref[...] = jnp.broadcast_to(jnp.sum(valid), (1, 1, 1))


def fused_forward(h0, mask, labels, params):
    B, S, _ = h0.shape
    stk = params["stack"]

    def per_batch(ndim):
        return lambda b, li: (b,) + (0,) * (ndim - 1)

    def per_layer(ndim):
        return lambda b, li: (li,) + (0,) * (ndim - 1)

    def fixed(ndim):
        return lambda b, li: (0,) * ndim

    args = [
        h0, mask, labels,
        params["emb_ln_g"], params["emb_ln_b"],
        stk["wqkv"], stk["bqkv"], stk["wo"], stk["bo"], stk["sa_g"], stk["sa_b"],
        stk["wf1"], stk["bf1"], stk["wf2"], stk["bf2"], stk["out_g"], stk["out_b"],
        params["cls_w_pad"], params["cls_b_pad"],
    ]

    in_specs = [
        pl.BlockSpec((1, S, DIM), per_batch(3)),                         # h0 (pre-LN embeddings)
        pl.BlockSpec((1, 1, S), per_batch(3)),                           # attention mask, O(B*S)
        pl.BlockSpec((1, S, 1), per_batch(3)),                           # labels
        pl.BlockSpec((1, DIM), fixed(2)),                                # emb LN gamma
        pl.BlockSpec((1, DIM), fixed(2)),                                # emb LN beta
        pl.BlockSpec((1, N_HEADS, DIM, 3 * HEAD_DIM), per_layer(4)),     # wqkv (head-major, streamed)
        pl.BlockSpec((1, N_HEADS, 1, 3 * HEAD_DIM), per_layer(4)),       # bqkv
        pl.BlockSpec((1, N_HEADS, HEAD_DIM, DIM), per_layer(4)),         # wo (head-major, streamed)
        pl.BlockSpec((1, 1, DIM), per_layer(3)),                         # bo
        pl.BlockSpec((1, 1, DIM), per_layer(3)),                         # sa LN gamma
        pl.BlockSpec((1, 1, DIM), per_layer(3)),                         # sa LN beta
        pl.BlockSpec((1, DIM, FFN_DIM), per_layer(3)),                   # wf1 (streamed)
        pl.BlockSpec((1, 1, FFN_DIM), per_layer(3)),                     # bf1
        pl.BlockSpec((1, FFN_DIM, DIM), per_layer(3)),                   # wf2 (streamed)
        pl.BlockSpec((1, 1, DIM), per_layer(3)),                         # bf2
        pl.BlockSpec((1, 1, DIM), per_layer(3)),                         # out LN gamma
        pl.BlockSpec((1, 1, DIM), per_layer(3)),                         # out LN beta
        pl.BlockSpec((DIM, CLS_PAD), fixed(2)),                          # classifier W (padded)
        pl.BlockSpec((1, CLS_PAD), fixed(2)),                            # classifier b (padded)
    ]

    out_shape = (
        jax.ShapeDtypeStruct((B, S, CLS_PAD), jnp.float32),              # padded logits
        jax.ShapeDtypeStruct((B, 1, 1), jnp.float32),                    # CE numerator per batch
        jax.ShapeDtypeStruct((B, 1, 1), jnp.float32),                    # CE valid-count per batch
    )
    out_specs = (
        pl.BlockSpec((1, S, CLS_PAD), per_batch(3)),
        pl.BlockSpec((1, 1, 1), per_batch(3)),
        pl.BlockSpec((1, 1, 1), per_batch(3)),
    )

    return pl.pallas_call(
        _fused_forward_kernel,
        out_shape=out_shape,
        grid=(B, N_LAYERS),
        in_specs=in_specs,
        out_specs=out_specs,
        scratch_shapes=[pltpu.VMEM((S, DIM), jnp.float32)],              # persistent activations
        compiler_params=pltpu.CompilerParams(
            dimension_semantics=("parallel", "arbitrary")),
    )(*args)


# ---------------- parameters (synthetic, deterministic) ----------------
def init_params(key):
    scale = 0.02
    inv_sqrt_d = 1.0 / math.sqrt(HEAD_DIM)
    keys = jax.random.split(key, 4 + N_LAYERS)

    def nrm(k, shape):
        return scale * jax.random.normal(k, shape, jnp.float32)

    params = {
        "word_emb": nrm(keys[0], (VOCAB, DIM)),
        "pos_emb":  nrm(keys[1], (MAX_POS, DIM)),
        "emb_ln_g": jnp.ones((1, DIM), jnp.float32),
        "emb_ln_b": jnp.zeros((1, DIM), jnp.float32),
    }

    # classifier, zero-padded to CLS_PAD output lanes (padding sliced off in wrapper)
    cls_w = nrm(keys[2], (DIM, NUM_LABELS))
    params["cls_w_pad"] = (jnp.zeros((DIM, CLS_PAD), jnp.bfloat16)
                           .at[:, :NUM_LABELS].set(cls_w.astype(jnp.bfloat16)))
    params["cls_b_pad"] = jnp.zeros((1, CLS_PAD), jnp.float32)

    def head_major(w):                      # (D, D) -> (H, D, head_dim)
        return jnp.transpose(w.reshape(DIM, N_HEADS, HEAD_DIM), (1, 0, 2))

    wqkv, bqkv, wo, bo = [], [], [], []
    sag, sab, wf1, bf1, wf2, bf2, og, ob = [], [], [], [], [], [], [], []
    for li in range(N_LAYERS):
        lk = jax.random.split(keys[4 + li], 6)
        wq = nrm(lk[0], (DIM, DIM)) * inv_sqrt_d   # fold 1/sqrt(head_dim) into Q weights
        wk = nrm(lk[1], (DIM, DIM))
        wv = nrm(lk[2], (DIM, DIM))
        # fused head-major QKV: (H, D, 3*head_dim) with lanes = [q_h | k_h | v_h]
        wqkv.append(jnp.concatenate([head_major(wq), head_major(wk), head_major(wv)], axis=-1))
        bqkv.append(jnp.zeros((N_HEADS, 1, 3 * HEAD_DIM), jnp.float32))  # q-part carries the fold too
        wo.append(nrm(lk[3], (DIM, DIM)).reshape(N_HEADS, HEAD_DIM, DIM))  # per-head rows of wo
        bo.append(jnp.zeros((1, DIM), jnp.float32))
        sag.append(jnp.ones((1, DIM), jnp.float32))
        sab.append(jnp.zeros((1, DIM), jnp.float32))
        wf1.append(nrm(lk[4], (DIM, FFN_DIM)))
        bf1.append(jnp.zeros((1, FFN_DIM), jnp.float32))
        wf2.append(nrm(lk[5], (FFN_DIM, DIM)))
        bf2.append(jnp.zeros((1, DIM), jnp.float32))
        og.append(jnp.ones((1, DIM), jnp.float32))
        ob.append(jnp.zeros((1, DIM), jnp.float32))

    def stack(xs, dtype=None):
        y = jnp.stack(xs, axis=0)
        return y.astype(dtype) if dtype is not None else y

    params["stack"] = {
        # MXU-facing weights stored bf16 (halves weight DMA); biases / LN stay f32
        "wqkv": stack(wqkv, jnp.bfloat16), "bqkv": stack(bqkv),
        "wo":   stack(wo,   jnp.bfloat16), "bo":   stack(bo),
        "sa_g": stack(sag),                "sa_b": stack(sab),
        "wf1":  stack(wf1,  jnp.bfloat16), "bf1":  stack(bf1),
        "wf2":  stack(wf2,  jnp.bfloat16), "bf2":  stack(bf2),
        "out_g": stack(og),                "out_b": stack(ob),
    }
    return params


# ---------------- model forward ----------------
def distilbert_ner_forward(params, input_ids, attention_mask, labels=None):
    B, S = input_ids.shape

    # embeddings: word + position gather (data-dependent -> plain JAX); LN runs in-kernel
    h0 = params["word_emb"][input_ids] + params["pos_emb"][None, :S, :]      # (B, S, D)
    mask = attention_mask.astype(jnp.float32).reshape(B, 1, S)               # O(B*S) key mask

    if labels is None:
        labels_in = jnp.full((B, S, 1), -100, jnp.int32)                     # dummy (loss unused)
    else:
        labels_in = labels.reshape(B, S, 1).astype(jnp.int32)

    logits_pad, lnum, lden = fused_forward(h0, mask, labels_in, params)
    logits = logits_pad[..., :NUM_LABELS]                                    # (B, S, NUM_LABELS)

    if labels is None:
        return {"logits": logits}
    # TODO(synk): PyTorch CrossEntropyLoss returns NaN when every label is -100;
    # guarded here to return 0 instead.
    loss = jnp.sum(lnum) / jnp.maximum(jnp.sum(lden), 1.0)
    return {"loss": loss, "logits": logits}


if __name__ == "__main__":
    key = jax.random.PRNGKey(0)
    pkey, idkey, lkey = jax.random.split(key, 3)

    params = init_params(pkey)

    B, S = 2, 8
    input_ids = jax.random.randint(idkey, (B, S), 0, VOCAB, dtype=jnp.int32)
    attention_mask = jnp.array([[1, 1, 1, 1, 1, 1, 1, 1],
                                [1, 1, 1, 1, 1, 1, 0, 0]], dtype=jnp.float32)
    labels = jax.random.randint(lkey, (B, S), 0, NUM_LABELS, dtype=jnp.int32)
    labels = jnp.where(attention_mask > 0, labels, -100)

    # labels == None path (returns logits only)
    out_no_labels = distilbert_ner_forward(params, input_ids, attention_mask)
    # labels path (returns loss + logits)
    out_with_labels = distilbert_ner_forward(params, input_ids, attention_mask, labels)

    jax.block_until_ready((out_no_labels["logits"],
                           out_with_labels["loss"],
                           out_with_labels["logits"]))
    print("KERNEL_OK")
</pallas_src>

<mosaic_0001>
module attributes {stable_mosaic.version = 11 : i64} {
  func.func @_fused_forward_kernel(%arg0: i32, %arg1: i32, %arg2: memref<1x8x32xf32, #tpu.memory_space<vmem>>, %arg3: memref<1x1x8xf32, #tpu.memory_space<vmem>>, %arg4: memref<1x8x1xi32, #tpu.memory_space<vmem>>, %arg5: memref<1x32xf32, #tpu.memory_space<vmem>>, %arg6: memref<1x32xf32, #tpu.memory_space<vmem>>, %arg7: memref<1x2x32x48xbf16, #tpu.memory_space<vmem>>, %arg8: memref<1x2x1x48xf32, #tpu.memory_space<vmem>>, %arg9: memref<1x2x16x32xbf16, #tpu.memory_space<vmem>>, %arg10: memref<1x1x32xf32, #tpu.memory_space<vmem>>, %arg11: memref<1x1x32xf32, #tpu.memory_space<vmem>>, %arg12: memref<1x1x32xf32, #tpu.memory_space<vmem>>, %arg13: memref<1x32x64xbf16, #tpu.memory_space<vmem>>, %arg14: memref<1x1x64xf32, #tpu.memory_space<vmem>>, %arg15: memref<1x64x32xbf16, #tpu.memory_space<vmem>>, %arg16: memref<1x1x32xf32, #tpu.memory_space<vmem>>, %arg17: memref<1x1x32xf32, #tpu.memory_space<vmem>>, %arg18: memref<1x1x32xf32, #tpu.memory_space<vmem>>, %arg19: memref<32x128xbf16, #tpu.memory_space<vmem>>, %arg20: memref<1x128xf32, #tpu.memory_space<vmem>>, %arg21: memref<1x8x128xf32, #tpu.memory_space<vmem>>, %arg22: memref<1x1x1xf32, #tpu.memory_space<vmem>>, %arg23: memref<1x1x1xf32, #tpu.memory_space<vmem>>, %arg24: memref<8x32xf32, #tpu.memory_space<vmem>>) attributes {dimension_semantics = [#tpu.dimension_semantics<parallel>, #tpu.dimension_semantics<arbitrary>], iteration_bounds = array<i64: 2, 2>, scalar_prefetch = 0 : i64, scratch_operands = 1 : i64, tpu.core_type = #tpu.core_type<tc>, window_params = [{transform_indices = @transform_0, window_bounds = array<i64: 1, 8, 32>}, {transform_indices = @transform_1, window_bounds = array<i64: 1, 1, 8>}, {transform_indices = @transform_2, window_bounds = array<i64: 1, 8, 1>}, {pipeline_mode = #tpu.pipeline_mode<synchronous>, transform_indices = @transform_3, window_bounds = array<i64: 1, 32>}, {pipeline_mode = #tpu.pipeline_mode<synchronous>, transform_indices = @transform_4, window_bounds = array<i64: 1, 32>}, {transform_indices = @transform_5, window_bounds = array<i64: 1, 2, 32, 48>}, {transform_indices = @transform_6, window_bounds = array<i64: 1, 2, 1, 48>}, {transform_indices = @transform_7, window_bounds = array<i64: 1, 2, 16, 32>}, {transform_indices = @transform_8, window_bounds = array<i64: 1, 1, 32>}, {transform_indices = @transform_9, window_bounds = array<i64: 1, 1, 32>}, {transform_indices = @transform_10, window_bounds = array<i64: 1, 1, 32>}, {transform_indices = @transform_11, window_bounds = array<i64: 1, 32, 64>}, {transform_indices = @transform_12, window_bounds = array<i64: 1, 1, 64>}, {transform_indices = @transform_13, window_bounds = array<i64: 1, 64, 32>}, {transform_indices = @transform_14, window_bounds = array<i64: 1, 1, 32>}, {transform_indices = @transform_15, window_bounds = array<i64: 1, 1, 32>}, {transform_indices = @transform_16, window_bounds = array<i64: 1, 1, 32>}, {pipeline_mode = #tpu.pipeline_mode<synchronous>, transform_indices = @transform_17, window_bounds = array<i64: 32, 128>}, {pipeline_mode = #tpu.pipeline_mode<synchronous>, transform_indices = @transform_18, window_bounds = array<i64: 1, 128>}, {transform_indices = @transform_19, window_bounds = array<i64: 1, 8, 128>}, {transform_indices = @transform_20, window_bounds = array<i64: 1, 1, 1>}, {transform_indices = @transform_21, window_bounds = array<i64: 1, 1, 1>}]} {
    %c0_i32 = arith.constant 0 : i32
    %0 = arith.cmpi eq, %arg1, %c0_i32 : i32
    %1 = arith.extui %0 : i1 to i32
    %c0_i32_0 = arith.constant 0 : i32
    %2 = arith.cmpi ne, %1, %c0_i32_0 : i32
    scf.if %2 {
      %c0_71 = arith.constant 0 : index
      %c0_72 = arith.constant 0 : index
      %c0_73 = arith.constant 0 : index
      %136 = vector.load %arg2[%c0_71, %c0_72, %c0_73] : memref<1x8x32xf32, #tpu.memory_space<vmem>>, vector<1x8x32xf32>
      %137 = vector.shape_cast %136 : vector<1x8x32xf32> to vector<8x32xf32>
      %c0_74 = arith.constant 0 : index
      %c0_75 = arith.constant 0 : index
      %138 = vector.load %arg5[%c0_74, %c0_75] : memref<1x32xf32, #tpu.memory_space<vmem>>, vector<1x32xf32>
      %c0_76 = arith.constant 0 : index
      %c0_77 = arith.constant 0 : index
      %139 = vector.load %arg6[%c0_76, %c0_77] : memref<1x32xf32, #tpu.memory_space<vmem>>, vector<1x32xf32>
      %cst_78 = arith.constant dense<0.000000e+00> : vector<8xf32>
      %140 = vector.multi_reduction <add>, %137, %cst_78 [1] : vector<8x32xf32> to vector<8xf32>
      %141 = vector.shape_cast %140 : vector<8xf32> to vector<8x1xf32>
      %cst_79 = arith.constant 3.200000e+01 : f32
      %142 = vector.broadcast %cst_79 : f32 to vector<8x1xf32>
      %143 = arith.divf %141, %142 : vector<8x1xf32>
      %144 = vector.broadcast %143 : vector<8x1xf32> to vector<8x32xf32>
      %145 = arith.subf %137, %144 : vector<8x32xf32>
      %146 = arith.mulf %145, %145 : vector<8x32xf32>
      %cst_80 = arith.constant dense<0.000000e+00> : vector<8xf32>
      %147 = vector.multi_reduction <add>, %146, %cst_80 [1] : vector<8x32xf32> to vector<8xf32>
      %148 = vector.shape_cast %147 : vector<8xf32> to vector<8x1xf32>
      %cst_81 = arith.constant 3.200000e+01 : f32
      %149 = vector.broadcast %cst_81 : f32 to vector<8x1xf32>
      %150 = arith.divf %148, %149 : vector<8x1xf32>
      %151 = vector.broadcast %143 : vector<8x1xf32> to vector<8x32xf32>
      %152 = arith.subf %137, %151 : vector<8x32xf32>
      %cst_82 = arith.constant 9.99999996E-13 : f32
      %153 = vector.broadcast %cst_82 : f32 to vector<8x1xf32>
      %154 = arith.addf %150, %153 : vector<8x1xf32>
      %155 = math.rsqrt %154 : vector<8x1xf32>
      %156 = vector.broadcast %155 : vector<8x1xf32> to vector<8x32xf32>
      %157 = arith.mulf %152, %156 : vector<8x32xf32>
      %158 = vector.broadcast %138 : vector<1x32xf32> to vector<8x32xf32>
      %159 = arith.mulf %157, %158 : vector<8x32xf32>
      %160 = vector.broadcast %139 : vector<1x32xf32> to vector<8x32xf32>
      %161 = arith.addf %159, %160 : vector<8x32xf32>
      %c0_83 = arith.constant 0 : index
      %c0_84 = arith.constant 0 : index
      %162 = vector.load %arg24[%c0_83, %c0_84] : memref<8x32xf32, #tpu.memory_space<vmem>>, vector<8x32xf32>
      tpu.vector_store %arg24[%c0_83, %c0_84], %161 {strides = array<i32>} : memref<8x32xf32, #tpu.memory_space<vmem>>, vector<8x32xf32>,
    } else {
    }
    %c0 = arith.constant 0 : index
    %c0_1 = arith.constant 0 : index
    %3 = vector.load %arg24[%c0, %c0_1] : memref<8x32xf32, #tpu.memory_space<vmem>>, vector<8x32xf32>
    %c0_2 = arith.constant 0 : index
    %c0_3 = arith.constant 0 : index
    %c0_4 = arith.constant 0 : index
    %4 = vector.load %arg3[%c0_2, %c0_3, %c0_4] : memref<1x1x8xf32, #tpu.memory_space<vmem>>, vector<1x1x8xf32>
    %cst = arith.constant 0.000000e+00 : f32
    %5 = vector.broadcast %cst : f32 to vector<1x1x8xf32>
    %6 = arith.cmpf ogt, %4, %5 : vector<1x1x8xf32>
    %7 = arith.truncf %3 : vector<8x32xf32> to vector<8x32xbf16>
    %8 = vector.shape_cast %7 : vector<8x32xbf16> to vector<1x8x32xbf16>
    %9 = vector.broadcast %8 : vector<1x8x32xbf16> to vector<2x8x32xbf16>
    %c0_5 = arith.constant 0 : index
    %c0_6 = arith.constant 0 : index
    %c0_7 = arith.constant 0 : index
    %c0_8 = arith.constant 0 : index
    %10 = vector.load %arg7[%c0_5, %c0_6, %c0_7, %c0_8] : memref<1x2x32x48xbf16, #tpu.memory_space<vmem>>, vector<1x2x32x48xbf16>
    %11 = vector.shape_cast %10 : vector<1x2x32x48xbf16> to vector<2x32x48xbf16>
    "tpu.trace_start"() <{level = 10 : i32, message = "hsd,hde->hse"}> : () -> ()
    %cst_9 = arith.constant dense<0.000000e+00> : vector<2x8x48xf32>
    %12 = tpu.matmul %9, %11, %cst_9 {dimension_numbers = #tpu.dot_dimension_numbers<[2], [1], [1], [2], [0, 0, 0, 1, 1, 2], [0], [0]>} : vector<2x8x32xbf16>, vector<2x32x48xbf16>, vector<2x8x48xf32> -> vector<2x8x48xf32>
    "tpu.trace_stop"() : () -> ()
    %c0_10 = arith.constant 0 : index
    %c0_11 = arith.constant 0 : index
    %c0_12 = arith.constant 0 : index
    %c0_13 = arith.constant 0 : index
    %13 = vector.load %arg8[%c0_10, %c0_11, %c0_12, %c0_13] : memref<1x2x1x48xf32, #tpu.memory_space<vmem>>, vector<1x2x1x48xf32>
    %14 = vector.shape_cast %13 : vector<1x2x1x48xf32> to vector<2x1x48xf32>
    %15 = vector.broadcast %14 : vector<2x1x48xf32> to vector<2x8x48xf32>
    %16 = arith.addf %12, %15 : vector<2x8x48xf32>
    %17 = vector.extract_strided_slice %16 {offsets = [0, 0, 0], sizes = [2, 8, 16], strides = [1, 1, 1]} : vector<2x8x48xf32> to vector<2x8x16xf32>
    %18 = vector.extract_strided_slice %16 {offsets = [0, 0, 16], sizes = [2, 8, 16], strides = [1, 1, 1]} : vector<2x8x48xf32> to vector<2x8x16xf32>
    %19 = vector.extract_strided_slice %16 {offsets = [0, 0, 32], sizes = [2, 8, 16], strides = [1, 1, 1]} : vector<2x8x48xf32> to vector<2x8x16xf32>
    %20 = arith.truncf %17 : vector<2x8x16xf32> to vector<2x8x16xbf16>
    %21 = arith.truncf %18 : vector<2x8x16xf32> to vector<2x8x16xbf16>
    "tpu.trace_start"() <{level = 10 : i32, message = "hqd,hkd->hqk"}> : () -> ()
    %cst_14 = arith.constant dense<0.000000e+00> : vector<2x8x8xf32>
    %22 = tpu.matmul %20, %21, %cst_14 {dimension_numbers = #tpu.dot_dimension_numbers<[2], [2], [1], [1], [0, 0, 0, 1, 1, 1], [0], [0]>} : vector<2x8x16xbf16>, vector<2x8x16xbf16>, vector<2x8x8xf32> -> vector<2x8x8xf32>
    %cst_15 = arith.constant -3.40282347E+38 : f32
    "tpu.trace_stop"() : () -> ()
    %23 = vector.shape_cast %6 : vector<1x1x8xi1> to vector<1x1x8xi1>
    %24 = vector.broadcast %23 : vector<1x1x8xi1> to vector<2x8x8xi1>
    %25 = vector.broadcast %cst_15 : f32 to vector<2x8x8xf32>
    %26 = arith.select %24, %22, %25 : vector<2x8x8xi1>, vector<2x8x8xf32>
    %cst_16 = arith.constant dense<0xFF800000> : vector<2x8xf32>
    %27 = vector.multi_reduction <maximumf>, %26, %cst_16 [2] : vector<2x8x8xf32> to vector<2x8xf32>
    %28 = vector.shape_cast %27 : vector<2x8xf32> to vector<2x8x1xf32>
    %29 = vector.broadcast %28 : vector<2x8x1xf32> to vector<2x8x8xf32>
    %30 = arith.subf %26, %29 : vector<2x8x8xf32>
    %31 = math.exp %30 : vector<2x8x8xf32>
    %cst_17 = arith.constant dense<0.000000e+00> : vector<2x8xf32>
    %32 = vector.multi_reduction <add>, %31, %cst_17 [2] : vector<2x8x8xf32> to vector<2x8xf32>
    %33 = vector.shape_cast %32 : vector<2x8xf32> to vector<2x8x1xf32>
    %34 = tpu.reciprocal %33 {approx = true} : vector<2x8x1xf32> -> vector<2x8x1xf32>
    %35 = vector.broadcast %34 : vector<2x8x1xf32> to vector<2x8x8xf32>
    %36 = arith.mulf %31, %35 : vector<2x8x8xf32>
    %37 = arith.truncf %36 : vector<2x8x8xf32> to vector<2x8x8xbf16>
    %38 = arith.truncf %19 : vector<2x8x16xf32> to vector<2x8x16xbf16>
    "tpu.trace_start"() <{level = 10 : i32, message = "hqk,hkd->hqd"}> : () -> ()
    %cst_18 = arith.constant dense<0.000000e+00> : vector<2x8x16xf32>
    %39 = tpu.matmul %37, %38, %cst_18 {dimension_numbers = #tpu.dot_dimension_numbers<[2], [1], [1], [2], [0, 0, 0, 1, 1, 2], [0], [0]>} : vector<2x8x8xbf16>, vector<2x8x16xbf16>, vector<2x8x16xf32> -> vector<2x8x16xf32>
    "tpu.trace_stop"() : () -> ()
    %40 = arith.truncf %39 : vector<2x8x16xf32> to vector<2x8x16xbf16>
    %c0_19 = arith.constant 0 : index
    %c0_20 = arith.constant 0 : index
    %c0_21 = arith.constant 0 : index
    %c0_22 = arith.constant 0 : index
    %41 = vector.load %arg9[%c0_19, %c0_20, %c0_21, %c0_22] : memref<1x2x16x32xbf16, #tpu.memory_space<vmem>>, vector<1x2x16x32xbf16>
    %42 = vector.shape_cast %41 : vector<1x2x16x32xbf16> to vector<2x16x32xbf16>
    "tpu.trace_start"() <{level = 10 : i32, message = "hqd,hde->hqe"}> : () -> ()
    %cst_23 = arith.constant dense<0.000000e+00> : vector<2x8x32xf32>
    %43 = tpu.matmul %40, %42, %cst_23 {dimension_numbers = #tpu.dot_dimension_numbers<[2], [1], [1], [2], [0, 0, 0, 1, 1, 2], [0], [0]>} : vector<2x8x16xbf16>, vector<2x16x32xbf16>, vector<2x8x32xf32> -> vector<2x8x32xf32>
    "tpu.trace_stop"() : () -> ()
    %cst_24 = arith.constant dense<0.000000e+00> : vector<8x32xf32>
    %44 = vector.multi_reduction <add>, %43, %cst_24 [0] : vector<2x8x32xf32> to vector<8x32xf32>
    %c0_25 = arith.constant 0 : index
    %c0_26 = arith.constant 0 : index
    %c0_27 = arith.constant 0 : index
    %45 = vector.load %arg10[%c0_25, %c0_26, %c0_27] : memref<1x1x32xf32, #tpu.memory_space<vmem>>, vector<1x1x32xf32>
    %46 = vector.shape_cast %45 : vector<1x1x32xf32> to vector<1x32xf32>
    %47 = vector.broadcast %46 : vector<1x32xf32> to vector<8x32xf32>
    %48 = arith.addf %44, %47 : vector<8x32xf32>
    %49 = arith.addf %48, %3 : vector<8x32xf32>
    %c0_28 = arith.constant 0 : index
    %c0_29 = arith.constant 0 : index
    %c0_30 = arith.constant 0 : index
    %50 = vector.load %arg11[%c0_28, %c0_29, %c0_30] : memref<1x1x32xf32, #tpu.memory_space<vmem>>, vector<1x1x32xf32>
    %51 = vector.shape_cast %50 : vector<1x1x32xf32> to vector<1x32xf32>
    %c0_31 = arith.constant 0 : index
    %c0_32 = arith.constant 0 : index
    %c0_33 = arith.constant 0 : index
    %52 = vector.load %arg12[%c0_31, %c0_32, %c0_33] : memref<1x1x32xf32, #tpu.memory_space<vmem>>, vector<1x1x32xf32>
    %53 = vector.shape_cast %52 : vector<1x1x32xf32> to vector<1x32xf32>
    %cst_34 = arith.constant dense<0.000000e+00> : vector<8xf32>
    %54 = vector.multi_reduction <add>, %49, %cst_34 [1] : vector<8x32xf32> to vector<8xf32>
    %55 = vector.shape_cast %54 : vector<8xf32> to vector<8x1xf32>
    %cst_35 = arith.constant 3.200000e+01 : f32
    %56 = vector.broadcast %cst_35 : f32 to vector<8x1xf32>
    %57 = arith.divf %55, %56 : vector<8x1xf32>
    %58 = vector.broadcast %57 : vector<8x1xf32> to vector<8x32xf32>
    %59 = arith.subf %49, %58 : vector<8x32xf32>
    %60 = arith.mulf %59, %59 : vector<8x32xf32>
    %cst_36 = arith.constant dense<0.000000e+00> : vector<8xf32>
    %61 = vector.multi_reduction <add>, %60, %cst_36 [1] : vector<8x32xf32> to vector<8xf32>
    %62 = vector.shape_cast %61 : vector<8xf32> to vector<8x1xf32>
    %cst_37 = arith.constant 3.200000e+01 : f32
    %63 = vector.broadcast %cst_37 : f32 to vector<8x1xf32>
    %64 = arith.divf %62, %63 : vector<8x1xf32>
    %65 = vector.broadcast %57 : vector<8x1xf32> to vector<8x32xf32>
    %66 = arith.subf %49, %65 : vector<8x32xf32>
    %cst_38 = arith.constant 9.99999996E-13 : f32
    %67 = vector.broadcast %cst_38 : f32 to vector<8x1xf32>
    %68 = arith.addf %64, %67 : vector<8x1xf32>
    %69 = math.rsqrt %68 : vector<8x1xf32>
    %70 = vector.broadcast %69 : vector<8x1xf32> to vector<8x32xf32>
    %71 = arith.mulf %66, %70 : vector<8x32xf32>
    %72 = vector.broadcast %51 : vector<1x32xf32> to vector<8x32xf32>
    %73 = arith.mulf %71, %72 : vector<8x32xf32>
    %74 = vector.broadcast %53 : vector<1x32xf32> to vector<8x32xf32>
    %75 = arith.addf %73, %74 : vector<8x32xf32>
    %c0_39 = arith.constant 0 : index
    %c0_40 = arith.constant 0 : index
    %c0_41 = arith.constant 0 : index
    %76 = vector.load %arg13[%c0_39, %c0_40, %c0_41] : memref<1x32x64xbf16, #tpu.memory_space<vmem>>, vector<1x32x64xbf16>
    %77 = vector.shape_cast %76 : vector<1x32x64xbf16> to vector<32x64xbf16>
    %78 = arith.truncf %75 : vector<8x32xf32> to vector<8x32xbf16>
    %cst_42 = arith.constant dense<0.000000e+00> : vector<8x64xf32>
    %79 = tpu.matmul %78, %77, %cst_42 {dimension_numbers = #tpu.dot_dimension_numbers<[1], [0], [0], [1], [0, 0, 1, 1], [], []>} : vector<8x32xbf16>, vector<32x64xbf16>, vector<8x64xf32> -> vector<8x64xf32>
    %c0_43 = arith.constant 0 : index
    %c0_44 = arith.constant 0 : index
    %c0_45 = arith.constant 0 : index
    %80 = vector.load %arg14[%c0_43, %c0_44, %c0_45] : memref<1x1x64xf32, #tpu.memory_space<vmem>>, vector<1x1x64xf32>
    %81 = vector.shape_cast %80 : vector<1x1x64xf32> to vector<1x64xf32>
    %82 = vector.broadcast %81 : vector<1x64xf32> to vector<8x64xf32>
    %83 = arith.addf %79, %82 : vector<8x64xf32>
    %cst_46 = arith.constant 5.000000e-01 : f32
    %84 = vector.broadcast %cst_46 : f32 to vector<8x64xf32>
    %85 = arith.mulf %84, %83 : vector<8x64xf32>
    %cst_47 = arith.constant 4.471500e-02 : f32
    %86 = vector.broadcast %cst_47 : f32 to vector<8x64xf32>
    %87 = arith.mulf %86, %83 : vector<8x64xf32>
    %88 = arith.mulf %87, %83 : vector<8x64xf32>
    %89 = arith.mulf %88, %83 : vector<8x64xf32>
    %90 = arith.addf %83, %89 : vector<8x64xf32>
    %cst_48 = arith.constant 0.797884583 : f32
    %91 = vector.broadcast %cst_48 : f32 to vector<8x64xf32>
    %92 = arith.mulf %91, %90 : vector<8x64xf32>
    %93 = math.tanh %92 : vector<8x64xf32>
    %cst_49 = arith.constant 1.000000e+00 : f32
    %94 = vector.broadcast %cst_49 : f32 to vector<8x64xf32>
    %95 = arith.addf %94, %93 : vector<8x64xf32>
    %96 = arith.mulf %85, %95 : vector<8x64xf32>
    %c0_50 = arith.constant 0 : index
    %c0_51 = arith.constant 0 : index
    %c0_52 = arith.constant 0 : index
    %97 = vector.load %arg15[%c0_50, %c0_51, %c0_52] : memref<1x64x32xbf16, #tpu.memory_space<vmem>>, vector<1x64x32xbf16>
    %98 = vector.shape_cast %97 : vector<1x64x32xbf16> to vector<64x32xbf16>
    %99 = arith.truncf %96 : vector<8x64xf32> to vector<8x64xbf16>
    %cst_53 = arith.constant dense<0.000000e+00> : vector<8x32xf32>
    %100 = tpu.matmul %99, %98, %cst_53 {dimension_numbers = #tpu.dot_dimension_numbers<[1], [0], [0], [1], [0, 0, 1, 1], [], []>} : vector<8x64xbf16>, vector<64x32xbf16>, vector<8x32xf32> -> vector<8x32xf32>
    %c0_54 = arith.constant 0 : index
    %c0_55 = arith.constant 0 : index
    %c0_56 = arith.constant 0 : index
    %101 = vector.load %arg16[%c0_54, %c0_55, %c0_56] : memref<1x1x32xf32, #tpu.memory_space<vmem>>, vector<1x1x32xf32>
    %102 = vector.shape_cast %101 : vector<1x1x32xf32> to vector<1x32xf32>
    %103 = vector.broadcast %102 : vector<1x32xf32> to vector<8x32xf32>
    %104 = arith.addf %100, %103 : vector<8x32xf32>
    %105 = arith.addf %104, %75 : vector<8x32xf32>
    %c0_57 = arith.constant 0 : index
    %c0_58 = arith.constant 0 : index
    %c0_59 = arith.constant 0 : index
    %106 = vector.load %arg17[%c0_57, %c0_58, %c0_59] : memref<1x1x32xf32, #tpu.memory_space<vmem>>, vector<1x1x32xf32>
    %107 = vector.shape_cast %106 : vector<1x1x32xf32> to vector<1x32xf32>
    %c0_60 = arith.constant 0 : index
    %c0_61 = arith.constant 0 : index
    %c0_62 = arith.constant 0 : index
    %108 = vector.load %arg18[%c0_60, %c0_61, %c0_62] : memref<1x1x32xf32, #tpu.memory_space<vmem>>, vector<1x1x32xf32>
    %109 = vector.shape_cast %108 : vector<1x1x32xf32> to vector<1x32xf32>
    %cst_63 = arith.constant dense<0.000000e+00> : vector<8xf32>
    %110 = vector.multi_reduction <add>, %105, %cst_63 [1] : vector<8x32xf32> to vector<8xf32>
    %111 = vector.shape_cast %110 : vector<8xf32> to vector<8x1xf32>
    %cst_64 = arith.constant 3.200000e+01 : f32
    %112 = vector.broadcast %cst_64 : f32 to vector<8x1xf32>
    %113 = arith.divf %111, %112 : vector<8x1xf32>
    %114 = vector.broadcast %113 : vector<8x1xf32> to vector<8x32xf32>
    %115 = arith.subf %105, %114 : vector<8x32xf32>
    %116 = arith.mulf %115, %115 : vector<8x32xf32>
    %cst_65 = arith.constant dense<0.000000e+00> : vector<8xf32>
    %117 = vector.multi_reduction <add>, %116, %cst_65 [1] : vector<8x32xf32> to vector<8xf32>
    %118 = vector.shape_cast %117 : vector<8xf32> to vector<8x1xf32>
    %cst_66 = arith.constant 3.200000e+01 : f32
    %119 = vector.broadcast %cst_66 : f32 to vector<8x1xf32>
    %120 = arith.divf %118, %119 : vector<8x1xf32>
    %121 = vector.broadcast %113 : vector<8x1xf32> to vector<8x32xf32>
    %122 = arith.subf %105, %121 : vector<8x32xf32>
    %cst_67 = arith.constant 9.99999996E-13 : f32
    %123 = vector.broadcast %cst_67 : f32 to vector<8x1xf32>
    %124 = arith.addf %120, %123 : vector<8x1xf32>
    %125 = math.rsqrt %124 : vector<8x1xf32>
    %126 = vector.broadcast %125 : vector<8x1xf32> to vector<8x32xf32>
    %127 = arith.mulf %122, %126 : vector<8x32xf32>
    %128 = vector.broadcast %107 : vector<1x32xf32> to vector<8x32xf32>
    %129 = arith.mulf %127, %128 : vector<8x32xf32>
    %130 = vector.broadcast %109 : vector<1x32xf32> to vector<8x32xf32>
    %131 = arith.addf %129, %130 : vector<8x32xf32>
    %c0_68 = arith.constant 0 : index
    %c0_69 = arith.constant 0 : index
    %132 = vector.load %arg24[%c0_68, %c0_69] : memref<8x32xf32, #tpu.memory_space<vmem>>, vector<8x32xf32>
    tpu.vector_store %arg24[%c0_68, %c0_69], %131 {strides = array<i32>} : memref<8x32xf32, #tpu.memory_space<vmem>>, vector<8x32xf32>,
    %c1_i32 = arith.constant 1 : i32
    %133 = arith.cmpi eq, %arg1, %c1_i32 : i32
    %134 = arith.extui %133 : i1 to i32
    %c0_i32_70 = arith.constant 0 : i32
    %135 = arith.cmpi ne, %134, %c0_i32_70 : i32
    scf.if %135 {
      %c0_71 = arith.constant 0 : index
      %c0_72 = arith.constant 0 : index
      %136 = vector.load %arg19[%c0_71, %c0_72] : memref<32x128xbf16, #tpu.memory_space<vmem>>, vector<32x128xbf16>
      %137 = arith.truncf %131 : vector<8x32xf32> to vector<8x32xbf16>
      %cst_73 = arith.constant dense<0.000000e+00> : vector<8x128xf32>
      %138 = tpu.matmul %137, %136, %cst_73 {dimension_numbers = #tpu.dot_dimension_numbers<[1], [0], [0], [1], [0, 0, 1, 1], [], []>} : vector<8x32xbf16>, vector<32x128xbf16>, vector<8x128xf32> -> vector<8x128xf32>
      %c0_74 = arith.constant 0 : index
      %c0_75 = arith.constant 0 : index
      %139 = vector.load %arg20[%c0_74, %c0_75] : memref<1x128xf32, #tpu.memory_space<vmem>>, vector<1x128xf32>
      %140 = vector.broadcast %139 : vector<1x128xf32> to vector<8x128xf32>
      %141 = arith.addf %138, %140 : vector<8x128xf32>
      %c0_76 = arith.constant 0 : index
      %c0_77 = arith.constant 0 : index
      %c0_78 = arith.constant 0 : index
      %142 = vector.load %arg21[%c0_76, %c0_77, %c0_78] : memref<1x8x128xf32, #tpu.memory_space<vmem>>, vector<1x8x128xf32>
      %143 = vector.shape_cast %142 : vector<1x8x128xf32> to vector<8x128xf32>
      %144 = vector.shape_cast %141 : vector<8x128xf32> to vector<1x8x128xf32>
      tpu.vector_store %arg21[%c0_76, %c0_77, %c0_78], %144 {strides = array<i32>} : memref<1x8x128xf32, #tpu.memory_space<vmem>>, vector<1x8x128xf32>,
      %c0_79 = arith.constant 0 : index
      %c0_80 = arith.constant 0 : index
      %c0_81 = arith.constant 0 : index
      %145 = vector.load %arg4[%c0_79, %c0_80, %c0_81] : memref<1x8x1xi32, #tpu.memory_space<vmem>>, vector<1x8x1xi32>
      %146 = vector.shape_cast %145 : vector<1x8x1xi32> to vector<8x1xi32>
      %147 = tpu.iota {dimensions = array<i32: 1>} : vector<8x128xi32>
      %c5_i32 = arith.constant 5 : i32
      %148 = vector.broadcast %c5_i32 : i32 to vector<8x128xi32>
      %149 = arith.cmpi slt, %147, %148 : vector<8x128xi32>
      %cst_82 = arith.constant -1.000000e+30 : f32
      %150 = vector.broadcast %cst_82 : f32 to vector<8x128xf32>
      %151 = arith.select %149, %141, %150 : vector<8x128xi1>, vector<8x128xf32>
      %cst_83 = arith.constant dense<0xFF800000> : vector<8xf32>
      %152 = vector.multi_reduction <maximumf>, %151, %cst_83 [1] : vector<8x128xf32> to vector<8xf32>
      %153 = vector.shape_cast %152 : vector<8xf32> to vector<8x1xf32>
      %154 = vector.broadcast %153 : vector<8x1xf32> to vector<8x128xf32>
      %155 = arith.subf %151, %154 : vector<8x128xf32>
      %156 = math.exp %155 : vector<8x128xf32>
      %cst_84 = arith.constant dense<0.000000e+00> : vector<8xf32>
      %157 = vector.multi_reduction <add>, %156, %cst_84 [1] : vector<8x128xf32> to vector<8xf32>
      %158 = vector.shape_cast %157 : vector<8xf32> to vector<8x1xf32>
      %159 = math.log %158 : vector<8x1xf32>
      %160 = vector.broadcast %159 : vector<8x1xf32> to vector<8x128xf32>
      %161 = arith.subf %155, %160 : vector<8x128xf32>
      %162 = vector.broadcast %146 : vector<8x1xi32> to vector<8x128xi32>
      %163 = arith.cmpi eq, %147, %162 : vector<8x128xi32>
      %cst_85 = arith.constant 0.000000e+00 : f32
      %164 = vector.broadcast %cst_85 : f32 to vector<8x128xf32>
      %165 = arith.select %163, %161, %164 : vector<8x128xi1>, vector<8x128xf32>
      %cst_86 = arith.constant dense<0.000000e+00> : vector<8xf32>
      %166 = vector.multi_reduction <add>, %165, %cst_86 [1] : vector<8x128xf32> to vector<8xf32>
      %167 = vector.shape_cast %166 : vector<8xf32> to vector<8x1xf32>
      %c-100_i32 = arith.constant -100 : i32
      %168 = vector.broadcast %c-100_i32 : i32 to vector<8x1xi32>
      %169 = arith.cmpi ne, %146, %168 : vector<8x1xi32>
      %170 = arith.extui %169 : vector<8x1xi1> to vector<8x1xi32>
      %171 = arith.sitofp %170 : vector<8x1xi32> to vector<8x1xf32>
      %172 = arith.mulf %167, %171 : vector<8x1xf32>
      %173 = vector.shape_cast %172 : vector<8x1xf32> to vector<1x8x1xf32>
      %cst_87 = arith.constant dense<0.000000e+00> : vector<1xf32>
      %174 = vector.multi_reduction <add>, %173, %cst_87 [1, 2] : vector<1x8x1xf32> to vector<1xf32>
      %175 = vector.shape_cast %174 : vector<1xf32> to vector<1x1x1xf32>
      %176 = vector.extract %175[0, 0, 0] : f32 from vector<1x1x1xf32>
      %cst_88 = arith.constant 0.000000e+00 : f32
      %177 = arith.subf %cst_88, %176 : f32
      %178 = vector.broadcast %177 : f32 to vector<1x1x1xf32>
      %c0_89 = arith.constant 0 : index
      %c0_90 = arith.constant 0 : index
      %c0_91 = arith.constant 0 : index
      %179 = vector.load %arg22[%c0_89, %c0_90, %c0_91] : memref<1x1x1xf32, #tpu.memory_space<vmem>>, vector<1x1x1xf32>
      tpu.vector_store %arg22[%c0_89, %c0_90, %c0_91], %178 {strides = array<i32>} : memref<1x1x1xf32, #tpu.memory_space<vmem>>, vector<1x1x1xf32>,
      %180 = vector.shape_cast %171 : vector<8x1xf32> to vector<1x8x1xf32>
      %cst_92 = arith.constant dense<0.000000e+00> : vector<1xf32>
      %181 = vector.multi_reduction <add>, %180, %cst_92 [1, 2] : vector<1x8x1xf32> to vector<1xf32>
      %182 = vector.shape_cast %181 : vector<1xf32> to vector<1x1x1xf32>
      %183 = vector.extract %182[0, 0, 0] : f32 from vector<1x1x1xf32>
      %184 = vector.broadcast %183 : f32 to vector<1x1x1xf32>
      %c0_93 = arith.constant 0 : index
      %c0_94 = arith.constant 0 : index
      %c0_95 = arith.constant 0 : index
      %185 = vector.load %arg23[%c0_93, %c0_94, %c0_95] : memref<1x1x1xf32, #tpu.memory_space<vmem>>, vector<1x1x1xf32>
      tpu.vector_store %arg23[%c0_93, %c0_94, %c0_95], %184 {strides = array<i32>} : memref<1x1x1xf32, #tpu.memory_space<vmem>>, vector<1x1x1xf32>,
    } else {
    }
    return
  }
  func.func @transform_0(%arg0: i32, %arg1: i32) -> (i32, i32, i32) {
    %c0_i32 = arith.constant 0 : i32
    %c0_i32_0 = arith.constant 0 : i32
    %c0_i32_1 = arith.constant 0 : i32
    return %arg0, %c0_i32, %c0_i32_0 : i32, i32, i32
  }
  func.func @transform_1(%arg0: i32, %arg1: i32) -> (i32, i32, i32) {
    %c0_i32 = arith.constant 0 : i32
    %c0_i32_0 = arith.constant 0 : i32
    %c0_i32_1 = arith.constant 0 : i32
    return %arg0, %c0_i32, %c0_i32_0 : i32, i32, i32
  }
  func.func @transform_2(%arg0: i32, %arg1: i32) -> (i32, i32, i32) {
    %c0_i32 = arith.constant 0 : i32
    %c0_i32_0 = arith.constant 0 : i32
    %c0_i32_1 = arith.constant 0 : i32
    return %arg0, %c0_i32, %c0_i32_0 : i32, i32, i32
  }
  func.func @transform_3(%arg0: i32, %arg1: i32) -> (i32, i32) {
    %c0_i32 = arith.constant 0 : i32
    %c0_i32_0 = arith.constant 0 : i32
    %c0_i32_1 = arith.constant 0 : i32
    return %c0_i32, %c0_i32_0 : i32, i32
  }
  func.func @transform_4(%arg0: i32, %arg1: i32) -> (i32, i32) {
    %c0_i32 = arith.constant 0 : i32
    %c0_i32_0 = arith.constant 0 : i32
    %c0_i32_1 = arith.constant 0 : i32
    return %c0_i32, %c0_i32_0 : i32, i32
  }
  func.func @transform_5(%arg0: i32, %arg1: i32) -> (i32, i32, i32, i32) {
    %c0_i32 = arith.constant 0 : i32
    %c0_i32_0 = arith.constant 0 : i32
    %c0_i32_1 = arith.constant 0 : i32
    %c0_i32_2 = arith.constant 0 : i32
    return %arg1, %c0_i32, %c0_i32_0, %c0_i32_1 : i32, i32, i32, i32
  }
  func.func @transform_6(%arg0: i32, %arg1: i32) -> (i32, i32, i32, i32) {
    %c0_i32 = arith.constant 0 : i32
    %c0_i32_0 = arith.constant 0 : i32
    %c0_i32_1 = arith.constant 0 : i32
    %c0_i32_2 = arith.constant 0 : i32
    return %arg1, %c0_i32, %c0_i32_0, %c0_i32_1 : i32, i32, i32, i32
  }
  func.func @transform_7(%arg0: i32, %arg1: i32) -> (i32, i32, i32, i32) {
    %c0_i32 = arith.constant 0 : i32
    %c0_i32_0 = arith.constant 0 : i32
    %c0_i32_1 = arith.constant 0 : i32
    %c0_i32_2 = arith.constant 0 : i32
    return %arg1, %c0_i32, %c0_i32_0, %c0_i32_1 : i32, i32, i32, i32
  }
  func.func @transform_8(%arg0: i32, %arg1: i32) -> (i32, i32, i32) {
    %c0_i32 = arith.constant 0 : i32
    %c0_i32_0 = arith.constant 0 : i32
    %c0_i32_1 = arith.constant 0 : i32
    return %arg1, %c0_i32, %c0_i32_0 : i32, i32, i32
  }
  func.func @transform_9(%arg0: i32, %arg1: i32) -> (i32, i32, i32) {
    %c0_i32 = arith.constant 0 : i32
    %c0_i32_0 = arith.constant 0 : i32
    %c0_i32_1 = arith.constant 0 : i32
    return %arg1, %c0_i32, %c0_i32_0 : i32, i32, i32
  }
  func.func @transform_10(%arg0: i32, %arg1: i32) -> (i32, i32, i32) {
    %c0_i32 = arith.constant 0 : i32
    %c0_i32_0 = arith.constant 0 : i32
    %c0_i32_1 = arith.constant 0 : i32
    return %arg1, %c0_i32, %c0_i32_0 : i32, i32, i32
  }
  func.func @transform_11(%arg0: i32, %arg1: i32) -> (i32, i32, i32) {
    %c0_i32 = arith.constant 0 : i32
    %c0_i32_0 = arith.constant 0 : i32
    %c0_i32_1 = arith.constant 0 : i32
    return %arg1, %c0_i32, %c0_i32_0 : i32, i32, i32
  }
  func.func @transform_12(%arg0: i32, %arg1: i32) -> (i32, i32, i32) {
    %c0_i32 = arith.constant 0 : i32
    %c0_i32_0 = arith.constant 0 : i32
    %c0_i32_1 = arith.constant 0 : i32
    return %arg1, %c0_i32, %c0_i32_0 : i32, i32, i32
  }
  func.func @transform_13(%arg0: i32, %arg1: i32) -> (i32, i32, i32) {
    %c0_i32 = arith.constant 0 : i32
    %c0_i32_0 = arith.constant 0 : i32
    %c0_i32_1 = arith.constant 0 : i32
    return %arg1, %c0_i32, %c0_i32_0 : i32, i32, i32
  }
  func.func @transform_14(%arg0: i32, %arg1: i32) -> (i32, i32, i32) {
    %c0_i32 = arith.constant 0 : i32
    %c0_i32_0 = arith.constant 0 : i32
    %c0_i32_1 = arith.constant 0 : i32
    return %arg1, %c0_i32, %c0_i32_0 : i32, i32, i32
  }
  func.func @transform_15(%arg0: i32, %arg1: i32) -> (i32, i32, i32) {
    %c0_i32 = arith.constant 0 : i32
    %c0_i32_0 = arith.constant 0 : i32
    %c0_i32_1 = arith.constant 0 : i32
    return %arg1, %c0_i32, %c0_i32_0 : i32, i32, i32
  }
  func.func @transform_16(%arg0: i32, %arg1: i32) -> (i32, i32, i32) {
    %c0_i32 = arith.constant 0 : i32
    %c0_i32_0 = arith.constant 0 : i32
    %c0_i32_1 = arith.constant 0 : i32
    return %arg1, %c0_i32, %c0_i32_0 : i32, i32, i32
  }
  func.func @transform_17(%arg0: i32, %arg1: i32) -> (i32, i32) {
    %c0_i32 = arith.constant 0 : i32
    %c0_i32_0 = arith.constant 0 : i32
    %c0_i32_1 = arith.constant 0 : i32
    return %c0_i32, %c0_i32_0 : i32, i32
  }
  func.func @transform_18(%arg0: i32, %arg1: i32) -> (i32, i32) {
    %c0_i32 = arith.constant 0 : i32
    %c0_i32_0 = arith.constant 0 : i32
    %c0_i32_1 = arith.constant 0 : i32
    return %c0_i32, %c0_i32_0 : i32, i32
  }
  func.func @transform_19(%arg0: i32, %arg1: i32) -> (i32, i32, i32) {
    %c0_i32 = arith.constant 0 : i32
    %c0_i32_0 = arith.constant 0 : i32
    %c0_i32_1 = arith.constant 0 : i32
    return %arg0, %c0_i32, %c0_i32_0 : i32, i32, i32
  }
  func.func @transform_20(%arg0: i32, %arg1: i32) -> (i32, i32, i32) {
    %c0_i32 = arith.constant 0 : i32
    %c0_i32_0 = arith.constant 0 : i32
    %c0_i32_1 = arith.constant 0 : i32
    return %arg0, %c0_i32, %c0_i32_0 : i32, i32, i32
  }
  func.func @transform_21(%arg0: i32, %arg1: i32) -> (i32, i32, i32) {
    %c0_i32 = arith.constant 0 : i32
    %c0_i32_0 = arith.constant 0 : i32
    %c0_i32_1 = arith.constant 0 : i32
    return %arg0, %c0_i32, %c0_i32_0 : i32, i32, i32
  }
}

</mosaic_0001>

<bundles_post_ra>
// kernel: tpu_custom_call.1
= control target key start
LH: loop header
LB: loop body
LE: loop exit
PB: predicated region body
PF: predicated region fallthrough
CT: control target
= control target key end

     0   :  { %s3734_s0 = inlined_call_operand.vmem [shape: f32[2,8,32], index: 0, kind: input, shape index: {}]   ;;  %s3735_s1 = inlined_call_operand.vmem [shape: f32[2,1,8], index: 1, kind: input, shape index: {}]   ;;  %s3736_s2 = inlined_call_operand.vmem [shape: s32[2,8,1], index: 2, kind: input, shape index: {}]   ;;  %s3737_s3 = inlined_call_operand.vmem [shape: f32[1,32], index: 3, kind: input, shape index: {}]   ;;  %s3738_s4 = inlined_call_operand.hbm [shape: f32[1,32], index: 4, kind: input, shape index: {}]   ;;  %s3739_s5 = inlined_call_operand.vmem [shape: bf16[2,2,32,48], index: 5, kind: input, shape index: {}]   ;;  %s3740_s6 = inlined_call_operand.hbm [shape: f32[2,2,1,48], index: 6, kind: input, shape index: {}]   ;;  %s3741_s7 = inlined_call_operand.vmem [shape: bf16[2,2,16,32], index: 7, kind: input, shape index: {}]   ;;  %s3742_s8 = inlined_call_operand.hbm [shape: f32[2,1,32], index: 8, kind: input, shape index: {}]   ;;  %s3743_s9 = inlined_call_operand.hbm [shape: f32[2,1,32], index: 9, kind: input, shape index: {}]   ;;  %s3744_s10 = inlined_call_operand.hbm [shape: f32[2,1,32], index: 10, kind: input, shape index: {}]   ;;  %s3745_s11 = inlined_call_operand.hbm [shape: bf16[2,32,64], index: 11, kind: input, shape index: {}]   ;;  %s3746_s12 = inlined_call_operand.hbm [shape: f32[2,1,64], index: 12, kind: input, shape index: {}]   ;;  %s3747_s13 = inlined_call_operand.vmem [shape: bf16[2,64,32], index: 13, kind: input, shape index: {}]   ;;  %s3748_s14 = inlined_call_operand.vmem [shape: f32[2,1,32], index: 14, kind: input, shape index: {}]   ;;  %s3749_s15 = inlined_call_operand.vmem [shape: f32[2,1,32], index: 15, kind: input, shape index: {}]   ;;  %s3750_s16 = inlined_call_operand.vmem [shape: f32[2,1,32], index: 16, kind: input, shape index: {}]   ;;  %s3751_s17 = inlined_call_operand.vmem [shape: bf16[32,128], index: 17, kind: input, shape index: {}]   ;;  %s3752_s18 = inlined_call_operand.vmem [shape: f32[1,128], index: 18, kind: input, shape index: {}]   ;;  %s3753_s19 = inlined_call_operand.hbm [shape: f32[2,8,128], index: 19, kind: output, shape index: {0}]   ;;  %s3754_s20 = inlined_call_operand.vmem [shape: f32[2,1,1], index: 20, kind: output, shape index: {1}]   ;;  %s3755_s21 = inlined_call_operand.vmem [shape: f32[2,1,1], index: 21, kind: output, shape index: {2}]  }
   0x1   :  { %3793 = sst [smem:[#allocation40_spill]] %s3734_s0 }
   0x2   :  { %3794 = sst [smem:[#allocation41_spill]] %s3735_s1 }
   0x3   :  { %3795 = sst [smem:[#allocation42_spill]] %s3736_s2 }
   0x4   :  { %3796 = sst [smem:[#allocation43_spill]] %s3737_s3 }
   0x5   :  { %3797 = sst [smem:[#allocation44_spill]] %s3738_s4 }
   0x6   :  { %3798 = sst [smem:[#allocation45_spill]] %s3739_s5 }
   0x7   :  { %3799 = sst [smem:[#allocation46_spill]] %s3740_s6 }
   0x8   :  { %3800 = sst [smem:[#allocation47_spill]] %s3741_s7 }
   0x9   :  { %3801 = sst [smem:[#allocation48_spill]] %s3742_s8 }
   0xa   :  { %3802 = sst [smem:[#allocation49_spill]] %s3743_s9 }
   0xb   :  { %3803 = sst [smem:[#allocation50_spill]] %s3744_s10 }
   0xc   :  { %3804 = sst [smem:[#allocation51_spill]] %s3745_s11 }
   0xd   :  { %3805 = sst [smem:[#allocation52_spill]] %s3746_s12 }
   0xe   :  { %3806 = sst [smem:[#allocation53_spill]] %s3747_s13 }
   0xf   :  { %3807 = sst [smem:[#allocation54_spill]] %s3748_s14 }
  0x10   :  { %3808 = sst [smem:[#allocation55_spill]] %s3749_s15 }
  0x11   :  { %3809 = sst [smem:[#allocation56_spill]] %s3750_s16 }
  0x12   :  { %3810 = sst [smem:[#allocation57_spill]] %s3751_s17 }
  0x13   :  { %3811 = sst [smem:[#allocation58_spill]] %s3752_s18 }
  0x14   :  { %3812 = sst [smem:[#allocation59_spill]] %s3753_s19 }
  0x15   :  { %3813 = sst [smem:[#allocation60_spill]] %s3754_s20 }
  0x16   :  { %3814 = sst [smem:[#allocation61_spill]] %s3755_s21 }
  0x17   :  { %27 = vsyncpa [#allocation4], 0 }
  0x18   :  { %28 = vsyncpa [#allocation7], 0 }
  0x19   :  { %30 = vsyncpa [#allocation7 + $0x1], 0 }
  0x1a   :  { %31 = vsyncpa [#allocation10], 0 }
  0x1b   :  { %33 = vsyncpa [#allocation10 + $0x1], 0 }
  0x1c   :  { %34 = vsyncpa [#allocation13], 0 }
  0x1d   :  { %36 = vsyncpa [#allocation13 + $0x1], 0 }
  0x1e   :  { %37 = vsyncpa [#allocation5], 0 }
  0x1f   :  { %39 = vsyncpa [#allocation5 + $0x1], 0  ;;  %s3096_s2 = smov 0   ;;  %s3098_s25 = smov 0  }
  0x20   :  { %s3100_s26 = smov 0   ;;  %s3102_s27 = smov 0  }
  0x21   :  { %s3104_s3 = smov 0   ;;  %s3106_s28 = smov 0  }
  0x22   :  { %s3108_s29 = smov 0   ;;  %s3110_s0 = smov 0  }
  0x23   :  { %s3112_s4 = smov 0   ;;  %s3114_s30 = smov 0  }
  0x24   :  { %s3116_s5 = smov 0  }
  0x25 LB: > { %3815 = sst [smem:[#allocation21_spill]] %s2924_s2  ;;  %s54_s22 = sadd.s32 1, %s2956_s4  ;;  %s2964_s5 = sphi %s3116_s5, %s45_s5   ;;  %s2960_s30 = sphi %s3114_s30, %s3914_s30   ;;  %s2956_s4 = sphi %s3112_s4, %s3913_s4   ;;  %s2952_s0 = sphi %s3110_s0, %s3912_s0   ;;  %s2948_s29 = sphi %s3108_s29, %s3911_s29   ;;  %s2944_s28 = sphi %s3106_s28, %s3910_s28   ;;  %s2940_s3 = sphi %s3104_s3, %s3909_s3   ;;  %s2936_s27 = sphi %s3102_s27, %s3908_s27   ;;  %s2932_s26 = sphi %s3100_s26, %s3907_s26   ;;  %s2928_s25 = sphi %s3098_s25, %s3906_s25   ;;  %s2924_s2 = sphi %s3096_s2, %s3905_s2  }
  0x26   : > { %3816 = sst [smem:[#allocation22_spill]] %s2928_s25  ;;  %s210_s23 = sadd.s32 1, %s2944_s28 }
  0x27   : > { %3817 = sst [smem:[#allocation23_spill]] %s2932_s26  ;;  %p3153_p0 = scmp.ge.s32.totalorder %s54_s22, 2 }
  0x28   : > { %3818 = sst [smem:[#allocation24_spill]] %s2940_s3  ;;  %p217_p1 = scmp.ne.s32.totalorder %s2944_s28, %s2940_s3 }
  0x29   : > { %3819 = sst [smem:[#allocation25_spill]] %s2944_s28  ;;  %p218_p2 = scmp.eq.s32.totalorder %s2964_s5, 0 }
  0x2a   : > { %3820 = sst [smem:[#allocation26_spill]] %s2948_s29  ;;  %s3916_s22 = smov (%p3153_p0, %s54_s22), 0 }
  0x2b   : > { %3821 = sst [smem:[#allocation27_spill]] %s2952_s0  ;;  %p219_p3 = por %p218_p2, %p217_p1 }
  0x2c   : > { %3822 = sst [smem:[#allocation28_spill]] %s2956_s4  ;;  %p2482_p4 = scmp.lt.s32.totalorder %s2964_s5, 4 }
  0x2d   : > { %3823 = sst [smem:[#allocation29_spill]] %s2960_s30  ;;  %s207_s24 = ssub.s32 %s2956_s4, %s3916_s22 }
  0x2e   : > { %3824 = sst [smem:[#allocation30_spill]] %s2964_s5  ;;  %s3168_s19 = sand.u32 1, %s2964_s5  }
  0x2f   : > { %s3825_s1 = scalar_select %p3153_p0, 1, 0 }
  0x30   : > { %3826 = sst [smem:[#allocation31_spill]] %s3916_s22  ;;  %p208_p5 = scmp.eq.s32.totalorder %s207_s24, 0 }
  0x31   : > { %s3171_s18 = sand.u32 1, %s2944_s28   ;;  %s2318_s17 = sshll.u32 %s2956_s4, 5 }
  0x32   : > { %s3175_s21 = scalar_select %p208_p5, %s2944_s28, %s210_s23  }
  0x33   : > { %s2251_s20 = sshll.u32 %s3171_s18, 1  ;;  %s3828_s6 = sld [smem:[#allocation46_spill]] }
  0x34   : > { %3827 = sst [smem:[#allocation32_spill]] %s3175_s21  ;;  %p3183_p6 = pnand %p2482_p4, %p219_p3 }
  0x35   : > { %s679_s24 = scalar_lea.vmem [#allocation6], %s2251_s20  ;;  %s3190_s23 = sshll.u32 %s2956_s4, 4 }
  0x36   : > { %s3829_s22 = scalar_select %p3183_p6, 1, 0 }
  0x37   : > { %s686_s13 = sshll.u32 %s679_s24, 4  ;;  %p3197_p8 = pneg %p3183_p6  ;;  %s3187_s13 = int_to_ptr.vmem [resolvable:$true] %s686_s13 }
  0x39   : > { %s3181_s14 = scalar_lea.hbm %s3828_s6, %s2318_s17  ;;  %s2627_s20 = scalar_lea.hbm %s3828_s6, 64 }
  0x3a   : > { %s2622_s28 = scalar_lea.hbm %s3181_s14, 32  ;;  %p2628_p11 = scmp.lt.u32.totalorder %s3181_s14, %s3828_s6 }
  0x3b   : > { %p2623_p7 = scmp.ne.s32.totalorder %s3181_s14, %s2622_s28  ;;  %p2629_p12 = scmp.lt.u32.totalorder %s2627_s20, %s2622_s28 }
  0x3c   : > { %s3830_s15 = scalar_select %p3197_p8, 1, 0 }
  0x3d   : > { %p2625_p9 = pnand %p3197_p8, %p2623_p7  ;;  %p2630_p13 = por %p2629_p12, %p2628_p11 }
  0x3e   : > { %p2631_p1 = scmp.lt.u32.totalorder %s2622_s28, %s3181_s14 }
  0x3f   : > { %p2626_p10 = pneg %p2625_p9 }
  0x40   : > { %p2632_p2 = por %p2631_p1, %p2630_p13 }
  0x42   : > { %p2633_p3 = pnand %p2632_p2, %p2626_p10 }
  0x44   : > { %2636 = shalt.err (!%p2633_p3)
}
  0x45   : > { %s2637_s21 = scalar_lea.vmem %s3187_s13, 32  ;;  %s2966_s16 = smov [#allocation6]  }
  0x46   : > { %p2638_p4 = scmp.ne.s32.totalorder %s3187_s13, %s2637_s21  ;;  %s2642_s17 = sshll.u32 %s2966_s16, 4  ;;  %s2643_s17 = int_to_ptr.vmem [resolvable:$false] %s2642_s17 }
  0x47   : > { %s2644_s7 = scalar_lea.vmem %s2643_s17, 64  ;;  %p2645_p9 = scmp.lt.s32.totalorder %s3187_s13, %s2643_s17 }
  0x48   : > { %p2640_p5 = pnand %p2638_p4, %p3197_p8  ;;  %p2646_p0 = scmp.lt.s32.totalorder %s2644_s7, %s2637_s21 }
  0x4a   : > { %p2641_p7 = pneg %p2640_p5  ;;  %p2647_p11 = por %p2646_p0, %p2645_p9 }
  0x4c   : > { %p2648_p12 = pnand %p2647_p11, %p2641_p7 }
  0x4e   : > { %2651 = shalt.err (!%p2648_p12)
}
  0x4f   : > { %s2967_s28 = smov 16   ;;  %s2968_s20 = smov 1  }
  0x50   : > { %s3831_s24 = scalar_lea.sflag [#allocation7], %s3168_s19  ;;  %s3832_s9 = sld [smem:[#allocation49_spill]] }
  0x51   : > { %2461 = dma.hbm_to_vmem [thread:$0]  (!%p3183_p6), %s3181_s14, 32, %s3187_s13, %s3831_s24, %s2967_s28, %s2967_s28, %s2968_s20  }
  0x52   : > { %s724_s17 = scalar_lea.vmem [#allocation9], %s3171_s18  ;;  %s3768_s29 = scalar_lea.sflag [#allocation10], %s3168_s19 }
  0x53   : > { %s731_s7 = sshll.u32 %s724_s17, 4  ;;  %s732_s7 = int_to_ptr.vmem [resolvable:$true] %s731_s7 }
  0x56   : > { %s3226_s21 = scalar_lea.hbm %s3832_s9, %s3190_s23  ;;  %s2657_s14 = scalar_lea.hbm %s3832_s9, 32 }
  0x57   : > { %s2652_s0 = scalar_lea.hbm %s3226_s21, 16  ;;  %p2658_p1 = scmp.lt.u32.totalorder %s3226_s21, %s3832_s9 }
  0x58   : > { %p2653_p0 = scmp.ne.s32.totalorder %s3226_s21, %s2652_s0  ;;  %p2659_p2 = scmp.lt.u32.totalorder %s2657_s14, %s2652_s0 }
  0x59   : > { %p2661_p4 = scmp.lt.u32.totalorder %s2652_s0, %s3226_s21 }
  0x5a   : > { %p2655_p10 = pnand %p2653_p0, %p3197_p8  ;;  %p2660_p3 = por %p2659_p2, %p2658_p1 }
  0x5c   : > { %p2656_p13 = pneg %p2655_p10  ;;  %p2662_p5 = por %p2661_p4, %p2660_p3 }
  0x5e   : > { %p2663_p7 = pnand %p2662_p5, %p2656_p13 }
  0x60   : > { %2666 = shalt.err (!%p2663_p7)
}
  0x61   : > { %s2667_s20 = scalar_lea.vmem %s732_s7, 16  ;;  %s2969_s24 = smov [#allocation9]  }
  0x62   : > { %p2668_p9 = scmp.ne.s32.totalorder %s732_s7, %s2667_s20  ;;  %s2672_s16 = sshll.u32 %s2969_s24, 4  ;;  %s2673_s16 = int_to_ptr.vmem [resolvable:$false] %s2672_s16 }
  0x63   : > { %s2674_s12 = scalar_lea.vmem %s2673_s16, 32  ;;  %p2675_p0 = scmp.lt.s32.totalorder %s732_s7, %s2673_s16 }
  0x64   : > { %p2670_p11 = pnand %p2668_p9, %p3197_p8  ;;  %p2676_p10 = scmp.lt.s32.totalorder %s2674_s12, %s2667_s20 }
  0x66   : > { %p2671_p12 = pneg %p2670_p11  ;;  %p2677_p6 = por %p2676_p10, %p2675_p0 }
  0x68   : > { %p2678_p1 = pnand %p2677_p6, %p2671_p12 }
  0x6a   : > { %2681 = shalt.err (!%p2678_p1)
}
  0x6b   : > { %p3833_p2 = scmp.ne.s32.totalorder %s3829_s22, 0  ;;  %s2257_s0 = sshll.u32 %s3171_s18, 4 }
  0x6c   : > { %s2319_s17 = sshll.u32 %s2956_s4, 8  ;;  %s3834_s11 = sld [smem:[#allocation51_spill]] }
  0x6d   : > { %2467 = dma.hbm_to_vmem [thread:$0]  (!%p3833_p2), %s3226_s21, 16, %s732_s7, %s3768_s29  }
  0x6e   : > { %s759_s28 = scalar_lea.vmem [#allocation12], %s2257_s0  ;;  %s3767_s24 = scalar_lea.sflag [#allocation13], %s3168_s19 }
  0x6f   : > { %s766_s20 = sshll.u32 %s759_s28, 4  ;;  %s3256_s20 = int_to_ptr.vmem [resolvable:$true] %s766_s20 }
  0x72   : > { %s3254_s6 = scalar_lea.hbm %s3834_s11, %s2319_s17  ;;  %s2687_s12 = scalar_lea.hbm %s3834_s11, 512 }
  0x73   : > { %s2682_s16 = scalar_lea.hbm %s3254_s6, 256  ;;  %p2688_p4 = scmp.lt.u32.totalorder %s3254_s6, %s3834_s11 }
  0x74   : > { %p2683_p6 = scmp.ne.s32.totalorder %s3254_s6, %s2682_s16  ;;  %p2689_p5 = scmp.lt.u32.totalorder %s2687_s12, %s2682_s16 }
  0x75   : > { %p2691_p9 = scmp.lt.u32.totalorder %s2682_s16, %s3254_s6 }
  0x76   : > { %p2685_p13 = pnand %p2683_p6, %p3197_p8  ;;  %p2690_p7 = por %p2689_p5, %p2688_p4 }
  0x78   : > { %p2686_p3 = pneg %p2685_p13  ;;  %p2692_p11 = por %p2691_p9, %p2690_p7 }
  0x7a   : > { %p2693_p12 = pnand %p2692_p11, %p2686_p3 }
  0x7c   : > { %2696 = shalt.err (!%p2693_p12)
}
  0x7d   : > { %s2697_s0 = scalar_lea.vmem %s3256_s20, 256  ;;  %s2970_s14 = smov [#allocation12]  }
  0x7e   : > { %p2698_p0 = scmp.ne.s32.totalorder %s3256_s20, %s2697_s0  ;;  %s2702_s28 = sshll.u32 %s2970_s14, 4  ;;  %s2703_s28 = int_to_ptr.vmem [resolvable:$false] %s2702_s28 }
  0x7f   : > { %s2704_s21 = scalar_lea.vmem %s2703_s28, 512  ;;  %p2705_p6 = scmp.lt.s32.totalorder %s3256_s20, %s2703_s28 }
  0x80   : > { %p2700_p10 = pnand %p2698_p0, %p3197_p8  ;;  %p2706_p13 = scmp.lt.s32.totalorder %s2704_s21, %s2697_s0 }
  0x82   : > { %p2701_p1 = pneg %p2700_p10  ;;  %p2707_p4 = por %p2706_p13, %p2705_p6 }
  0x84   : > { %p2708_p5 = pnand %p2707_p4, %p2701_p1 }
  0x86   : > { %2711 = shalt.err (!%p2708_p5)
}
  0x87   : > { %s2971_s16 = smov 64   ;;  %s2972_s7 = smov 4  }
  0x88   : > { %2473 = dma.hbm_to_vmem [thread:$0]  (!%p3833_p2), %s3254_s6, 256, %s3256_s20, %s3767_s24, %s2971_s16, %s2971_s16, %s2972_s7  }
  0x89   : > { %s3283_s12 = sadd.s32 4294967295, %s2964_s5   ;;  %s2247_s17 = sadd.s32 4294967294, %s2964_s5  }
  0x8a   : > { %s57_s13 = sadd.s32 1, %s2960_s30  ;;  %p223_p3 = scmp.ne.s32.totalorder %s2940_s3, %s2936_s27 }
  0x8b   : > { %p3835_p7 = scmp.ne.s32.totalorder %s3825_s1, 0  ;;  %p3773_p9 = scmp.eq.s32.totalorder %s3283_s12, 0 }
  0x8c   : > { %s538_s0 = sadd.s32 1, %s2932_s26  ;;  %p548_p12 = scmp.ne.s32.totalorder %s2932_s26, %s2928_s25 }
  0x8d   : > { %s3918_s13 = smov (!%p3835_p7, %s57_s13), %s2960_s30  ;;  %p3298_p0 = por %p3773_p9, %p223_p3 }
  0x8e   : > { %p59_p11 = scmp.ge.s32.totalorder %s3918_s13, 2  ;;  %p549_p10 = scmp.eq.s32.totalorder %s3283_s12, 3 }
  0x8f   : > { %s3836_s6 = scalar_select %p3298_p0, 1, 0 }
  0x90   : > { %s3920_s13 = smov (%p59_p11, %s3918_s13), 0  ;;  %p3305_p1 = por %p549_p10, %p548_p12 }
  0x91   : > { %3837 = sst [smem:[#allocation33_spill]] %s3920_s13  ;;  %p554_p6 = scmp.ne.s32.totalorder %s2928_s25, %s2924_s2 }
  0x92   : > { %s3838_s27 = scalar_select %p3305_p1, 1, 0 }
  0x93   : > { %s535_s1 = ssub.s32 %s2960_s30, %s3920_s13  ;;  %p555_p13 = scmp.eq.s32.totalorder %s2247_s17, 3 }
  0x94   : > { %3839 = sst [smem:[#allocation34_spill]] %s3838_s27  ;;  %p536_p4 = scmp.eq.s32.totalorder %s535_s1, 0 }
  0x95   : > { %p2248_p5 = scmp.ge.s32.totalorder %s2964_s5, 1  ;;  %p3314_p3 = por %p555_p13, %p554_p6 }
  0x96   : > { %p614_p7 = scmp.lt.s32.totalorder %s2964_s5, 5  ;;  %s2973_s21 = smov [#allocation3]  }
  0x97   : > { %s3840_s20 = scalar_select %p3314_p3, 1, 0 }
  0x98   : > { %s3320_s14 = scalar_select %p536_p4, %s2932_s26, %s538_s0  }
  0x99   : > { %3841 = sst [smem:[#allocation35_spill]] %s3840_s20  ;;  %p3322_p11 = pnand %p2248_p5, %p614_p7 }
  0x9a   : > { %3842 = sst [smem:[#allocation36_spill]] %s3320_s14  ;;  %s630_s16 = sshll.u32 %s2973_s21, 4  ;;  %s631_s16 = int_to_ptr.vmem [resolvable:$true] %s630_s16 }
  0x9b   : > { %s3843_s28 = scalar_select %p3322_p11, 1, 0 }
  0x9c   : > { %p2454_p12 = pneg %p3322_p11  ;;  %s3844_s8 = sld [smem:[#allocation48_spill]] }
  0x9d   : > { %s707_s0 = scalar_lea.vmem [#allocation8], %s3171_s18  ;;  %s3846_s10 = sld [smem:[#allocation50_spill]] }
  0x9e   : > { %p3336_p10 = pnand %p2454_p12, %p3773_p9  ;;  %s714_s29 = sshll.u32 %s707_s0, 4  ;;  %s3341_s29 = int_to_ptr.vmem [resolvable:$true] %s714_s29 }
  0x9f   : > { %s3847_s7 = sld [smem:[#allocation44_spill]] }
  0xa0   : > { %p2714_p13 = pneg %p3336_p10 }
  0xa2   : > { %s3332_s1 = scalar_lea.hbm %s3844_s8, %s3190_s23 }
  0xa3   : > { %s3347_s21 = scalar_lea.hbm %s3846_s10, %s3190_s23 }
  0xa5   : > { %s2712_s17 = scalar_lea.hbm %s3847_s7, 16 }
  0xa6   : > { %p2713_p6 = scmp.ne.s32.totalorder %s3847_s7, %s2712_s17  ;;  %p2719_p7 = scmp.lt.u32.totalorder %s2712_s17, %s3847_s7 }
  0xa8   : > { %p2715_p4 = pnand %p2714_p13, %p2713_p6 }
  0xaa   : > { %p2716_p5 = pneg %p2715_p4 }
  0xac   : > { %p2721_p12 = pnand %p2719_p7, %p2716_p5 }
  0xae   : > { %2724 = shalt.err (!%p2721_p12)
}
  0xaf   : > { %s2725_s9 = scalar_lea.vmem %s631_s16, 16  ;;  %s2732_s11 = scalar_lea.vmem %s631_s16, 32 }
  0xb0   : > { %p2726_p9 = scmp.ne.s32.totalorder %s631_s16, %s2725_s9  ;;  %p2733_p0 = scmp.lt.s32.totalorder %s631_s16, %s631_s16 }
  0xb1   : > { %p2734_p11 = scmp.lt.s32.totalorder %s2732_s11, %s2725_s9 }
  0xb2   : > { %p2728_p3 = pnand %p2726_p9, %p2714_p13 }
  0xb3   : > { %p2735_p2 = por %p2734_p11, %p2733_p0 }
  0xb4   : > { %p2729_p1 = pneg %p2728_p3 }
  0xb6   : > { %p2736_p8 = pnand %p2735_p2, %p2729_p1 }
  0xb8   : > { %2739 = shalt.err (!%p2736_p8)
}
  0xb9   : > { %2457 = dma.hbm_to_vmem [thread:$0]  (!%p3336_p10), %s3847_s7, 16, %s631_s16, [#allocation4]  }
  0xba   : > { %s2740_s26 = scalar_lea.hbm %s3332_s1, 16  ;;  %p3848_p3 = scmp.ne.s32.totalorder %s3830_s15, 0 }
  0xbb   : > { %p2741_p9 = scmp.ne.s32.totalorder %s3332_s1, %s2740_s26  ;;  %s2745_s17 = scalar_lea.hbm %s3844_s8, 32 }
  0xbc   : > { %p2746_p8 = scmp.lt.u32.totalorder %s3332_s1, %s3844_s8  ;;  %p2747_p2 = scmp.lt.u32.totalorder %s2745_s17, %s2740_s26 }
  0xbd   : > { %p2743_p6 = pnand %p2741_p9, %p3848_p3  ;;  %p2749_p1 = scmp.lt.u32.totalorder %s2740_s26, %s3332_s1 }
  0xbe   : > { %p2748_p0 = por %p2747_p2, %p2746_p8 }
  0xbf   : > { %p2744_p13 = pneg %p2743_p6 }
  0xc0   : > { %p2750_p11 = por %p2749_p1, %p2748_p0 }
  0xc2   : > { %p2751_p4 = pnand %p2750_p11, %p2744_p13 }
  0xc4   : > { %2754 = shalt.err (!%p2751_p4)
}
  0xc5   : > { %s2755_s16 = scalar_lea.vmem %s3341_s29, 16  ;;  %s2974_s9 = smov [#allocation8]  }
  0xc6   : > { %p2756_p10 = scmp.ne.s32.totalorder %s3341_s29, %s2755_s16  ;;  %s2760_s11 = sshll.u32 %s2974_s9, 4  ;;  %s2761_s11 = int_to_ptr.vmem [resolvable:$false] %s2760_s11 }
  0xc7   : > { %s2762_s4 = scalar_lea.vmem %s2761_s11, 32  ;;  %p2763_p12 = scmp.lt.s32.totalorder %s3341_s29, %s2761_s11 }
  0xc8   : > { %p2758_p5 = pnand %p2756_p10, %p3848_p3  ;;  %p2764_p9 = scmp.lt.s32.totalorder %s2762_s4, %s2755_s16 }
  0xca   : > { %p2759_p7 = pneg %p2758_p5  ;;  %p2765_p6 = por %p2764_p9, %p2763_p12 }
  0xcc   : > { %p2766_p8 = pnand %p2765_p6, %p2759_p7 }
  0xce   : > { %2769 = shalt.err (!%p2766_p8)
}
  0xcf   : > { %p3849_p13 = scmp.ne.s32.totalorder %s3829_s22, 0  ;;  %s3850_s30 = scalar_lea.sflag [#allocation7], %s3168_s19 }
  0xd0   : > { %s741_s26 = scalar_lea.vmem [#allocation11], %s3171_s18  ;;  %s3851_s0 = sld [smem:[#allocation52_spill]] }
  0xd1   : > { %2464 = dma.hbm_to_vmem [thread:$0]  (!%p3849_p13), %s3332_s1, 16, %s3341_s29, %s3850_s30  }
  0xd2   : > { %s748_s13 = sshll.u32 %s741_s26, 4  ;;  %s2770_s9 = scalar_lea.hbm %s3347_s21, 16  ;;  %s749_s13 = int_to_ptr.vmem [resolvable:$true] %s748_s13 }
  0xd3   : > { %p2771_p2 = scmp.ne.s32.totalorder %s3347_s21, %s2770_s9  ;;  %s2775_s7 = scalar_lea.hbm %s3846_s10, 32 }
  0xd4   : > { %p2776_p11 = scmp.lt.u32.totalorder %s3347_s21, %s3846_s10  ;;  %p2777_p4 = scmp.lt.u32.totalorder %s2775_s7, %s2770_s9 }
  0xd5   : > { %p2773_p0 = pnand %p2771_p2, %p3848_p3  ;;  %p2779_p5 = scmp.lt.u32.totalorder %s2770_s9, %s3347_s21 }
  0xd6   : > { %s3852_s24 = smov %s3851_s0  ;;  %s3393_s16 = scalar_lea.hbm %s3851_s0, %s3190_s23 }
  0xd7   : > { %p2774_p1 = pneg %p2773_p0  ;;  %p2778_p10 = por %p2777_p4, %p2776_p11 }
  0xd9   : > { %p2780_p7 = por %p2779_p5, %p2778_p10 }
  0xdb   : > { %p2781_p12 = pnand %p2780_p7, %p2774_p1 }
  0xdd   : > { %2784 = shalt.err (!%p2781_p12)
}
  0xde   : > { %s2785_s29 = scalar_lea.vmem %s749_s13, 16  ;;  %s2975_s23 = smov [#allocation11]  }
  0xdf   : > { %p2786_p9 = scmp.ne.s32.totalorder %s749_s13, %s2785_s29  ;;  %s2790_s1 = sshll.u32 %s2975_s23, 4  ;;  %s2791_s1 = int_to_ptr.vmem [resolvable:$false] %s2790_s1 }
  0xe0   : > { %s2792_s30 = scalar_lea.vmem %s2791_s1, 32  ;;  %p2793_p2 = scmp.lt.s32.totalorder %s749_s13, %s2791_s1 }
  0xe1   : > { %p2788_p6 = pnand %p2786_p9, %p3848_p3  ;;  %p2794_p0 = scmp.lt.s32.totalorder %s2792_s30, %s2785_s29 }
  0xe3   : > { %p2789_p8 = pneg %p2788_p6  ;;  %p2795_p13 = por %p2794_p0, %p2793_p2 }
  0xe5   : > { %p2796_p4 = pnand %p2795_p13, %p2789_p8 }
  0xe7   : > { %2799 = shalt.err (!%p2796_p4)
}
  0xe8   : > { %p3853_p11 = scmp.ne.s32.totalorder %s3829_s22, 0  ;;  %s3854_s8 = scalar_lea.sflag [#allocation10], %s3168_s19 }
  0xe9   : > { %s779_s20 = scalar_lea.vmem [#allocation14], %s3171_s18  ;;  %s2800_s26 = scalar_lea.hbm %s3393_s16, 16 }
  0xea   : > { %2470 = dma.hbm_to_vmem [thread:$0]  (!%p3853_p11), %s3347_s21, 16, %s749_s13, %s3854_s8  }
  0xeb   : > { %s786_s7 = sshll.u32 %s779_s20, 4  ;;  %p2801_p1 = scmp.ne.s32.totalorder %s3393_s16, %s2800_s26  ;;  %s787_s7 = int_to_ptr.vmem [resolvable:$true] %s786_s7 }
  0xec   : > { %s2805_s0 = scalar_lea.hbm %s3852_s24, 32  ;;  %p2806_p5 = scmp.lt.u32.totalorder %s3393_s16, %s3852_s24 }
  0xed   : > { %p2803_p13 = pnand %p2801_p1, %p3848_p3  ;;  %p2807_p7 = scmp.lt.u32.totalorder %s2805_s0, %s2800_s26 }
  0xee   : > { %p2809_p9 = scmp.lt.u32.totalorder %s2800_s26, %s3393_s16 }
  0xef   : > { %p2804_p10 = pneg %p2803_p13  ;;  %p2808_p12 = por %p2807_p7, %p2806_p5 }
  0xf1   : > { %p2810_p6 = por %p2809_p9, %p2808_p12 }
  0xf3   : > { %p2811_p8 = pnand %p2810_p6, %p2804_p10 }
  0xf5   : > { %2814 = shalt.err (!%p2811_p8)
}
  0xf6   : > { %s2815_s18 = scalar_lea.vmem %s787_s7, 16  ;;  %s2976_s21 = smov [#allocation14]  }
  0xf7   : > { %p2816_p2 = scmp.ne.s32.totalorder %s787_s7, %s2815_s18  ;;  %s2820_s13 = sshll.u32 %s2976_s21, 4  ;;  %s2821_s13 = int_to_ptr.vmem [resolvable:$false] %s2820_s13 }
  0xf8   : > { %s2822_s4 = scalar_lea.vmem %s2821_s13, 32  ;;  %p2823_p1 = scmp.lt.s32.totalorder %s787_s7, %s2821_s13 }
  0xf9   : > { %p2818_p0 = pnand %p2816_p2, %p3848_p3  ;;  %p2824_p13 = scmp.lt.s32.totalorder %s2822_s4, %s2815_s18 }
  0xfb   : > { %p2819_p4 = pneg %p2818_p0  ;;  %p2825_p11 = por %p2824_p13, %p2823_p1 }
  0xfd   : > { %p2826_p5 = pnand %p2825_p11, %p2819_p4 }
  0xff   : > { %2829 = shalt.err (!%p2826_p5)
}
 0x100   : > { %p3855_p7 = scmp.ne.s32.totalorder %s3829_s22, 0  ;;  %s3856_s29 = scalar_lea.sflag [#allocation13], %s3168_s19 }
 0x101   : > { %p3857_p10 = scmp.ne.s32.totalorder %s3843_s28, 0 }
 0x102   : > { %2476 = dma.hbm_to_vmem [thread:$0]  (!%p3855_p7), %s3393_s16, 16, %s787_s7, %s3856_s29  }
 0x103   : > { %821 = sbr.rel (%p3857_p10) target bundleno = 3922 (0xf52), region = 96 }
 0x10a   : > { %p3858_p3 = scmp.eq.s32.totalorder %s3283_s12, 0 }
 0x10c   : > { %2903 = dma.done.wait (%p3858_p3), [#allocation4], 16   ;;  %p3859_p12 = pmov %p3858_p3 }
 0x10d   : > { %s827_s15 = sand.u32 1, %s3283_s12   ;;  %s3442_s23 = sand.u32 1, %s2940_s3  }
 0x10e   : > { %2905 = vsyncadd (%p3859_p12), [#allocation4], 4294967280  ;;  %s2263_s22 = sshll.u32 %s3442_s23, 1  ;;  %s828_s19 = scalar_lea.sflag [#allocation7], %s827_s15 }
 0x10f   : > { %s3445_s1 = scalar_lea.vmem [#allocation6], %s2263_s22  ;;  %p3860_p11 = scmp.ne.s32.totalorder %s3836_s6, 0 }
 0x111   : > { %2907 = dma.done.wait (%p3860_p11), %s828_s19, 48  }
 0x112   : > { %2909 = vsyncadd (%p3860_p11), %s828_s19, 4294967248  ;;  %s845_s16 = scalar_lea.sflag [#allocation10], %s827_s15 }
 0x113   : > { %2911 = dma.done.wait (%p3860_p11), %s845_s16, 32  }
 0x114   : > { %2913 = vsyncadd (%p3860_p11), %s845_s16, 4294967264  ;;  %s2264_s12 = sshll.u32 %s3442_s23, 4  ;;  %s861_s20 = scalar_lea.sflag [#allocation13], %s827_s15 }
 0x115   : > { %s3459_s7 = scalar_lea.vmem [#allocation12], %s2264_s12 }
 0x116   : > { %3861 = sst [smem:[#allocation37_spill]] %s3459_s7 }
 0x117   : > { %2915 = dma.done.wait (%p3860_p11), %s861_s20, 272  }
 0x118   : > { %2917 = vsyncadd (%p3860_p11), %s861_s20, 4294967024  ;;  %s3862_s26 = sld [smem:[#allocation27_spill]]  ;;  %s3863_s14 = sld [smem:[#allocation26_spill]] }
 0x119   : > { %s3782_s17 = sand.u32 1, %s2928_s25   ;;  %s3865_s15 = sld [smem:[#allocation40_spill]] }
 0x11a   : > { %s3468_s0 = sshll.u32 %s3782_s17, 3  ;;  %s3866_s12 = sld [smem:[#allocation42_spill]] }
 0x11b   : > { %s3868_s10 = sld [smem:[#allocation45_spill]]  ;;  %s3869_s11 = sld [smem:[#allocation47_spill]] }
 0x11c   : > { %s3870_s29 = sld [smem:[#allocation53_spill]]  ;;  %s3872_s16 = sld [smem:[#allocation54_spill]] }
 0x11d   : > { %s3873_s27 = sld [smem:[#allocation55_spill]]  ;;  %s3874_s25 = sld [smem:[#allocation56_spill]] }
 0x11e   : > { %p993_p9 = scmp.lt.s32.totalorder %s3862_s26, 1  ;;  %p1004_p6 = scmp.lt.s32.totalorder %s3863_s14, 1 }
 0x11f   : > { %p2274_p8 = scmp.ne.s32.totalorder %s3863_s14, 0 }
 0x120   : > { %s3922_s26 = smov (!%p993_p9, %s3862_s26), 1  ;;  %vm1042_vm0 = vcmask (!%p2274_p8), 261120   ;;  %v2276_v13 = vld [vmem:[#allocation3] ss:$0 sm:$0xff] (!%p2274_p8) }
 0x121   : > { %s3476_s6 = scalar_select %p1004_p6, %s3863_s14, 1 }
 0x122   : > { %s2266_s9 = sshll.u32 %s3922_s26, 3 }
 0x123   : > { %s996_s22 = scalar_lea.vmem %s3865_s15, %s2266_s9  ;;  %s3489_s20 = scalar_lea.vmem %s3866_s12, %s2266_s9 }
 0x124   : > { %3867 = sst [smem:[#allocation38_spill]] %s3489_s20  ;;  %s2320_s17 = sshll.u32 %s3476_s6, 5  ;;  %v1039_v0 = vld [vmem:[%s996_s22] sm:$0xff] (!%p2274_p8) }
 0x125   : > { %s2321_s8 = sshll.u32 %s3476_s6, 4  ;;  %s3496_s24 = scalar_lea.vmem %s3868_s10, %s2320_s17  ;;  %v1043_v1 = vsel (!%p2274_p8), %vm1042_vm0, %v1039_v0, 0.0 }
 0x126   : > { %s3501_s18 = scalar_lea.vmem %s3869_s11, %s2321_s8  ;;  %s3506_s15 = scalar_lea.vmem %s3870_s29, %s2320_s17  ;;  %1044 = vadd.xlane.f32.xlu0 (!%p2274_p8), %v1043_v1 }
 0x127   : > { %3871 = sst [smem:[#allocation39_spill]] %s3506_s15  ;;  %s1021_s12 = scalar_lea.vmem %s3872_s16, %s3476_s6 }
 0x128   : > { %s1024_s28 = scalar_lea.vmem %s3873_s27, %s3476_s6  ;;  %s1027_s20 = scalar_lea.vmem %s3874_s25, %s3476_s6 }
 0x129   : > { %s3875_s8 = sld [smem:[#allocation60_spill]]  ;;  %s3876_s17 = sld [smem:[#allocation61_spill]] }
 0x12a   : > { %s872_s29 = scalar_lea.vmem [#allocation14], %s3442_s23  ;;  %s982_s15 = scalar_lea.vmem [#allocation15], %s3468_s0 }
 0x12b   : > { %1038 = sbr.rel (%p2274_p8) target bundleno = 607 (0x25f), region = 128  ;;  %s3877_s27 = sld [smem:[#allocation43_spill]] (!%p2274_p8) }
 0x12f   : > { %s1030_s11 = scalar_lea.vmem %s3875_s8, %s3922_s26  ;;  %s1033_s4 = scalar_lea.vmem %s3876_s17, %s3922_s26 }
 0x131   : > { %v2275_v11 = vld [vmem:[%s3877_s27] ss:$0 sm:$0xff] (!%p2274_p8) }
 0x1b3   : > { %v1045_v2 = vpop.xlane.xlu0 %1044 }
 0x1b4   : > { %v1047_v3 = vmul.f32 0.03125, %v1045_v2 }
 0x1b6   : > { %v1048_v4 = vsub.f32 %v1039_v0, %v1047_v3 }
 0x1b8   : > { %v1049_v5 = vmul.f32 %v1048_v4, %v1048_v4 }
 0x1ba   : > { %v1050_v6 = vsel %vm1042_vm0, %v1049_v5, 0.0 }
 0x1bb   : > { %1051 = vadd.xlane.f32.xlu0 %v1050_v6 }
 0x248   : > { %v1052_v7 = vpop.xlane.xlu0 %1051 }
 0x249   : > { %v1053_v8 = vmul.f32 0.03125, %v1052_v7 }
 0x24b   : > { %v1054_v9 = vadd.f32 1e-12, %v1053_v8 }
 0x24d   : > { %2586 = vrsqrt.f32 %v1054_v9 }
 0x257   : > { %v2587_v10 = vpop.eup %2586 }
 0x258   : > { %v1056_v12 = vmul.f32 %v2587_v10, %v1048_v4 }
 0x25a   : > { %v1063_v14 = vmul.f32 %v2275_v11, %v1056_v12 }
 0x25c   : > { %v1070_v15 = vadd.f32 %v2276_v13, %v1063_v14 }
 0x25e   : > { %1071 = vst.msk [vmem:[#allocation2] sm:$0xff] %vm1042_vm0, %v1070_v15 }
 0x25f PF: > { %v2588_v16 = vld [vmem:[%s3496_s24] sm:$0xff]   ;;  %v2977_v17 = vmov 0.0   ;;  %v2589_v18 = vld [vmem:[%s3496_s24 + $0x10] sm:$0xff]   ;;  %v2590_v19 = vld [vmem:[%s3496_s24 + $0x8] sm:$0xff]   ;;  %vm2978_vm1 = vmmov 0   ;;  %vm1110_vm2 = vcmask 261120   ;;  %v1308_v41 = vlaneseq }
 0x260   : > { %2352 = vmatprep.subr.bf16.mxu0 %v2977_v17  ;;  %2360 = vmatprep.subr.bf16.mxu1 %v2977_v17  ;;  %v2591_v20 = vld [vmem:[%s3496_s24 + $0x18] sm:$0xff]   ;;  %v2277_v23 = vld [vmem:[%s3445_s1] ss:$0 sm:$0xff]  ;;  %v2278_v24 = vld [vmem:[%s3445_s1 + $0x1] ss:$0 sm:$0xff]  ;;  %s2979_s24 = smov 112  }
 0x261   : > { %2353 = vmatpush3.bf16.msra.mxu0 %v2588_v16  ;;  %2356 = vmatprep.mubr.msk.bf16.mxu0 %vm2978_vm1, %v2977_v17  ;;  %vm1211_vm3 = vcmask 130048   ;;  %s3878_s14 = sld [smem:[#allocation41_spill]]  ;;  %v1309_v43 = vshrl.u32 %v1308_v41, 7  ;;  %v2980_v45 = vmov 0   ;;  %vm1315_vm6 = vcmask 64512   ;;  %s2981_s22 = smov 96  }
 0x262   : > { %2361 = vmatpush3.bf16.msra.mxu1 %v2589_v18  ;;  %2354 = vmatprep.subr.bf16.mxu0 %v2977_v17  ;;  %vm1345_vm7 = vcmask 1043456   ;;  %s3881_s19 = sld [smem:[#allocation37_spill]]  ;;  %s3882_s9 = sld [smem:[#allocation39_spill]]  ;;  %vm1699_vm8 = vcmask 523264  }
 0x263   : > { %2362 = vmatprep.subr.bf16.mxu1 %v2977_v17  ;;  %2364 = vmatprep.mubr.msk.bf16.mxu1 %vm2978_vm1, %v2977_v17  ;;  %v1310_v44 = vsub.s32 0, %v1309_v43  ;;  %s3883_s16 = scalar_lea.vmem [#allocation9], %s3442_s23  ;;  %s3884_s10 = scalar_lea.vmem [#allocation11], %s3442_s23 }
 0x264   : > { %s3888_s25 = sld [smem:[#allocation26_spill]] }
 0x265   : > { %v3547_v21 = vld [vmem:[#allocation2] sm:$0xff]  ;;  %2355 = vmatpush3.bf16.msra.mxu0 %v2590_v19 }
 0x266   : > { %v1075_v22 = vpack.c.bf16 %v3547_v21, %v3547_v21  ;;  %2363 = vmatpush3.bf16.msra.mxu1 %v2591_v20  ;;  %2368 = vmatprep.subr.bf16.mxu0 %v2977_v17  ;;  %v2592_v19 = vld [vmem:[%s3501_s18] sm:$0xff]   ;;  %v2593_v20 = vld [vmem:[%s3501_s18 + $0x8] sm:$0xff]   ;;  %s3880_s18 = scalar_lea.vmem [#allocation8], %s3442_s23 }
 0x267   : > { %2374 = vmatprep.subr.bf16.mxu1 %v2977_v17  ;;  %s3879_s13 = scalar_lea.vmem %s3878_s14, %s3922_s26 }
 0x268   : > { %2357 = vmatmul.mubr.msk.bf16.vlgmr.msra.gmra.mrb[0].mxu0 %vm1110_vm2, %v1075_v22  ;;  %v1073_v42 = vld [vmem:[%s3879_s13] sm:$0x1] }
 0x269   : > { %2365 = vmatmul.mubr.msk.bf16.vlgmr.msra.gmra.mrb[0].mxu1 %vm1110_vm2, %v1075_v22  ;;  %2370 = vmatprep.mubr.msk.bf16.mxu0 %vm2978_vm1, %v2977_v17  ;;  %vm1074_vm4 = vcmp.gt.f32.partialorder %v1073_v42, 0.0 }
 0x26a   : > { %2376 = vmatprep.mubr.msk.bf16.mxu1 %vm2978_vm1, %v2977_v17  ;;  %v1307_v46 = vsel %vm1074_vm4, 1, %v2980_v45  ;;  %p2308_p2 = scmp.ne.s32.totalorder %s3888_s25, 1 }
 0x26b   : > { %v1311_v47 = vrot.slane %v1307_v46, %v1310_v44  ;;  %vm2983_vm9 = vmmov (!%p2308_p2), 0   ;;  %s3890_s6 = sld [smem:[#allocation38_spill]] (!%p2308_p2)  ;;  %s3891_s14 = sld [smem:[#allocation58_spill]] (!%p2308_p2)  ;;  %vm1872_vm13 = vcmask (!%p2308_p2), 7168   ;;  %vm1885_vm14 = vcmask (!%p2308_p2), 0  }
 0x26d   : > { %vm1312_vm5 = vcmp.eq.s32.totalorder %v1311_v47, 1 }
 0x33b   : > { %v1148_v25 = vpop.f32.mrb[0].mxu0 }
 0x33c   : > { %v1149_v26 = vadd.f32 %v2277_v23, %v1148_v25  ;;  %v2358_v27 = vpop.f32.mrb[1].mxu0  ;;  %v1200_v28 = vpop.f32.mrb[0].mxu1 }
 0x33d   : > { %v1201_v29 = vadd.f32 %v2278_v24, %v1200_v28  ;;  %v1151_v30 = vpop.f32.mrb[2].mxu0  ;;  %v2366_v31 = vpop.f32.mrb[1].mxu1 }
 0x33e   : > { %v1206_v32 = vpack.c.bf16 %v1149_v26, %v1149_v26  ;;  %v2359_v33 = vpop.f32.mrb[3].mxu0  ;;  %v1203_v34 = vpop.f32.mrb[2].mxu1 }
 0x33f   : > { %v2367_v35 = vpop.f32.mrb[3].mxu1  ;;  %v1207_v36 = vpack.c.bf16 %v1201_v29, %v1201_v29 }
 0x340   : > { %1209 = vrot.lane.b32.xlu0 %v1206_v32, %s2979_s24 }
 0x344   : > { %1259 = vrot.lane.b32.xlu0 %v1207_v36, %s2979_s24  ;;  %s3889_s24 = sld [smem:[#allocation57_spill]] (!%p2308_p2) }
 0x3b2   : > { %v1210_v37 = vpop.permute.xlu0 %1209 }
 0x3b3   : > { %v1216_v38 = vsel %vm1211_vm3, %v1210_v37, 0 }
 0x3b4   : > { %2369 = vmatpush3.bf16.xpose.msra.mxu0 %v1216_v38 }
 0x3b5   : > { %2380 = vmatprep.subr.bf16.mxu0 %v2977_v17 }
 0x3b6   : > { %v1260_v39 = vpop.permute.xlu0 %1259 }
 0x3b7   : > { %v1265_v40 = vsel %vm1211_vm3, %v1260_v39, 0  ;;  %v2293_v39 = vld [vmem:[%s3880_s18] ss:$0 sm:$0xff] }
 0x3b8   : > { %2375 = vmatpush3.bf16.xpose.msra.mxu1 %v1265_v40 }
 0x3b9   : > { %2386 = vmatprep.subr.bf16.mxu1 %v2977_v17 }
 0x3bb   : > { %2371 = vmatmul.mubr.msk.bf16.vlgmr.msra.gmra.mrb[4].mxu0 %vm1211_vm3, %v1206_v32 }
 0x3bc   : > { %2382 = vmatprep.mubr.msk.bf16.mxu0 %vm2978_vm1, %v2977_v17 }
 0x3bf   : > { %2377 = vmatmul.mubr.msk.bf16.vlgmr.msra.gmra.mrb[4].mxu1 %vm1211_vm3, %v1207_v36 }
 0x3c0   : > { %2388 = vmatprep.mubr.msk.bf16.mxu1 %vm2978_vm1, %v2977_v17 }
 0x48e   : > { %v1252_v48 = vpop.f32.mrb[4].mxu0 }
 0x48f   : > { %v1313_v49 = vsel %vm1312_vm5, %v1252_v48, -3.4028235e+38  ;;  %v2372_v50 = vpop.f32.mrb[5].mxu0 }
 0x490   : > { %v1255_v51 = vpop.f32.mrb[6].mxu0  ;;  %v1316_v52 = vsel %vm1315_vm6, %v1313_v49, -inf }
 0x491   : > { %1317 = vmax.xlane.f32.xlu1 %v1316_v52  ;;  %v2373_v53 = vpop.f32.mrb[7].mxu0 }
 0x492   : > { %v1301_v54 = vpop.f32.mrb[4].mxu1  ;;  %v2594_v53 = vld [vmem:[%s3881_s19] sm:$0xff]  }
 0x493   : > { %v1314_v55 = vsel %vm1312_vm5, %v1301_v54, -3.4028235e+38  ;;  %v2378_v56 = vpop.f32.mrb[5].mxu1  ;;  %v2595_v54 = vld [vmem:[%s3881_s19 + $0x8] sm:$0xff]  }
 0x494   : > { %v1304_v57 = vpop.f32.mrb[6].mxu1  ;;  %v1319_v58 = vsel %vm1315_vm6, %v1314_v55, -inf }
 0x495   : > { %v2379_v59 = vpop.f32.mrb[7].mxu1  ;;  %1320 = vmax.xlane.f32.xlu1 %v1319_v58  ;;  %v2294_v58 = vld [vmem:[%s3883_s16] ss:$0 sm:$0xff] }
 0x4a6   : > { %1340 = vrot.lane.b32.xlu1 %v1206_v32, %s2981_s22 }
 0x51e   : > { %v1318_v60 = vpop.xlane.xlu1 %1317 }
 0x51f   : > { %v1322_v61 = vsub.f32 %v1313_v49, %v1318_v60  ;;  %v2295_v60 = vld [vmem:[%s3884_s10] ss:$0 sm:$0xff] }
 0x521   : > { %v1324_v62 = vmul.f32 1.442695, %v1322_v61 }
 0x522   : > { %v1321_v63 = vpop.xlane.xlu1 %1320 }
 0x523   : > { %2600 = vpow2.f32 %v1324_v62  ;;  %v1323_v0 = vsub.f32 %v1314_v55, %v1321_v63 }
 0x525   : > { %v1326_v1 = vmul.f32 1.442695, %v1323_v0  ;;  %v2596_v0 = vld [vmem:[%s3882_s9] sm:$0xff]  }
 0x526   : > { %v1341_v2 = vpop.permute.xlu1 %1340 }
 0x527   : > { %2602 = vpow2.f32 %v1326_v1  ;;  %v1347_v3 = vsel %vm1345_vm7, %v1341_v2, 0  ;;  %v2597_v1 = vld [vmem:[%s3882_s9 + $0x8] sm:$0xff]   ;;  %v2598_v2 = vld [vmem:[%s3882_s9 + $0x10] sm:$0xff]  }
 0x528   : > { %2381 = vmatpush3.bf16.msra.mxu0 %v1347_v3  ;;  %v2599_v3 = vld [vmem:[%s3882_s9 + $0x18] sm:$0xff]  }
 0x529   : > { %2392 = vmatprep.subr.bf16.mxu0 %v2977_v17 }
 0x52d   : > { %v2601_v4 = vpop.eup %2600 }
 0x52e   : > { %v1328_v5 = vsel %vm1315_vm6, %v2601_v4, 0.0 }
 0x52f   : > { %1329 = vadd.xlane.f32.xlu0 %v1328_v5 }
 0x531   : > { %v2603_v6 = vpop.eup %2602 }
 0x532   : > { %v1331_v7 = vsel %vm1315_vm6, %v2603_v6, 0.0 }
 0x533   : > { %1332 = vadd.xlane.f32.xlu1 %v1331_v7 }
 0x544   : > { %1389 = vrot.lane.b32.xlu1 %v1207_v36, %s2981_s22 }
 0x5bc   : > { %v1330_v8 = vpop.xlane.xlu0 %1329 }
 0x5bd   : > { %2604 = vrcp.f32 %v1330_v8 }
 0x5c0   : > { %v1333_v9 = vpop.xlane.xlu1 %1332 }
 0x5c1   : > { %2606 = vrcp.f32 %v1333_v9 }
 0x5c4   : > { %v1390_v10 = vpop.permute.xlu1 %1389 }
 0x5c5   : > { %v1395_v11 = vsel %vm1345_vm7, %v1390_v10, 0 }
 0x5c6   : > { %2387 = vmatpush3.bf16.msra.mxu1 %v1395_v11 }
 0x5c7   : > { %v2605_v12 = vpop.eup %2604  ;;  %2398 = vmatprep.subr.bf16.mxu1 %v2977_v17 }
 0x5c8   : > { %v1336_v13 = vmul.f32 %v2605_v12, %v2601_v4  ;;  %v2296_v4 = vld [vmem:[%s872_s29] ss:$0 sm:$0xff] }
 0x5ca   : > { %v1338_v14 = vpack.c.bf16 %v1336_v13, %v1336_v13 }
 0x5cb   : > { %v2607_v15 = vpop.eup %2606 }
 0x5cc   : > { %v1337_v16 = vmul.f32 %v2607_v15, %v2603_v6  ;;  %2383 = vmatmul.mubr.msk.bf16.vlgmr.msra.gmra.mrb[8].mxu0 %vm1315_vm6, %v1338_v14 }
 0x5cd   : > { %2394 = vmatprep.mubr.msk.bf16.mxu0 %vm2978_vm1, %v2977_v17  ;;  %2393 = vmatpush3.bf16.msra.mxu0 %v2592_v19 }
 0x5ce   : > { %v1339_v18 = vpack.c.bf16 %v1337_v16, %v1337_v16  ;;  %2404 = vmatprep.subr.bf16.mxu0 %v2977_v17 }
 0x5d0   : > { %2389 = vmatmul.mubr.msk.bf16.vlgmr.msra.gmra.mrb[8].mxu1 %vm1315_vm6, %v1339_v18 }
 0x5d1   : > { %2400 = vmatprep.mubr.msk.bf16.mxu1 %vm2978_vm1, %v2977_v17  ;;  %2399 = vmatpush3.bf16.msra.mxu1 %v2593_v20  ;;  %v2300_v20 = vld [vmem:[%s1021_s12] ss:$0 sm:$0xff] }
 0x5d2   : > { %2412 = vmatprep.subr.bf16.mxu1 %v2977_v17 }
 0x69f   : > { %v1383_v22 = vpop.f32.mrb[8].mxu0 }
 0x6a0   : > { %v1437_v23 = vpack.c.bf16 %v1383_v22, %v1383_v22  ;;  %v2384_v24 = vpop.f32.mrb[9].mxu0 }
 0x6a1   : > { %v1386_v25 = vpop.f32.mrb[10].mxu0 }
 0x6a2   : > { %v2385_v26 = vpop.f32.mrb[11].mxu0  ;;  %2395 = vmatmul.mubr.msk.bf16.vlgmr.msra.gmra.mrb[12].mxu0 %vm1211_vm3, %v1437_v23 }
 0x6a3   : > { %v1431_v27 = vpop.f32.mrb[8].mxu1  ;;  %2408 = vmatprep.mubr.msk.bf16.mxu0 %vm2978_vm1, %v2977_v17  ;;  %2405 = vmatpush3.bf16.msra.mxu0 %v2594_v53 }
 0x6a4   : > { %v1438_v28 = vpack.c.bf16 %v1431_v27, %v1431_v27  ;;  %v2390_v29 = vpop.f32.mrb[9].mxu1  ;;  %2406 = vmatprep.subr.bf16.mxu0 %v2977_v17 }
 0x6a5   : > { %v1434_v30 = vpop.f32.mrb[10].mxu1 }
 0x6a6   : > { %v2391_v31 = vpop.f32.mrb[11].mxu1  ;;  %2401 = vmatmul.mubr.msk.bf16.vlgmr.msra.gmra.mrb[12].mxu1 %vm1211_vm3, %v1438_v28 }
 0x6a7   : > { %2420 = vmatprep.mubr.msk.bf16.mxu1 %vm2978_vm1, %v2977_v17  ;;  %2407 = vmatpush3.bf16.msra.mxu0 %v2595_v54 }
 0x6a8   : > { %2413 = vmatpush3.bf16.msra.mxu1 %v2596_v0 }
 0x6a9   : > { %2414 = vmatprep.subr.bf16.mxu1 %v2977_v17 }
 0x6ac   : > { %2415 = vmatpush3.bf16.msra.mxu1 %v2597_v1 }
 0x6ad   : > { %2416 = vmatprep.subr.bf16.mxu1 %v2977_v17 }
 0x6b0   : > { %2417 = vmatpush3.bf16.msra.mxu1 %v2598_v2 }
 0x6b1   : > { %2418 = vmatprep.subr.bf16.mxu1 %v2977_v17 }
 0x6b4   : > { %2419 = vmatpush3.bf16.msra.mxu1 %v2599_v3 }
 0x775   : > { %v1486_v32 = vpop.f32.mrb[12].mxu0 }
 0x776   : > { %v2396_v33 = vpop.f32.mrb[13].mxu0  ;;  %v1541_v37 = vsel %vm1110_vm2, %v1486_v32, 0.0 }
 0x777   : > { %v1489_v34 = vpop.f32.mrb[14].mxu0 }
 0x778   : > { %v2397_v35 = vpop.f32.mrb[15].mxu0 }
 0x779   : > { %v1535_v36 = vpop.f32.mrb[12].mxu1 }
 0x77a   : > { %v1542_v38 = vsel %vm1110_vm2, %v1535_v36, 0.0  ;;  %v2402_v40 = vpop.f32.mrb[13].mxu1 }
 0x77b   : > { %v1543_v42 = vadd.f32 %v1542_v38, %v1541_v37  ;;  %v1538_v43 = vpop.f32.mrb[14].mxu1  ;;  %v2306_v38 = vld [vmem:[%s1024_s28] ss:$0 sm:$0xff] }
 0x77c   : > { %v2403_v44 = vpop.f32.mrb[15].mxu1  ;;  %v2307_v40 = vld [vmem:[%s1027_s20] ss:$0 sm:$0xff] }
 0x77d   : > { %v1551_v45 = vadd.f32 %v2293_v39, %v1543_v42  ;;  %v2616_v44 = vld [vmem:[%s3889_s24] sm:$0xff] (!%p2308_p2)  }
 0x77f   : > { %v1552_v46 = vadd.f32 %v1551_v45, %v3547_v21  ;;  %v2982_v45 = vmov (!%p2308_p2), 0.0  }
 0x780   : > { %2424 = vmatprep.subr.bf16.mxu0 (!%p2308_p2), %v2982_v45 }
 0x781   : > { %v1555_v47 = vsel %vm1110_vm2, %v1552_v46, 0.0 }
 0x782   : > { %1556 = vadd.xlane.f32.xlu1 %v1555_v47 }
 0x80f   : > { %v1557_v48 = vpop.xlane.xlu1 %1556 }
 0x810   : > { %v1559_v49 = vmul.f32 0.03125, %v1557_v48  ;;  %v1848_v48 = vand.u32 (!%p2308_p2), 127, %v1308_v41 }
 0x812   : > { %v1560_v50 = vsub.f32 %v1552_v46, %v1559_v49  ;;  %v2617_v46 = vld [vmem:[%s3889_s24 + $0x8] sm:$0xff] (!%p2308_p2)   ;;  %v2309_v49 = vld [vmem:[%s3891_s14] ss:$0 sm:$0xff] (!%p2308_p2)  ;;  %vm1849_vm10 = vcmp.lt.s32.totalorder (!%p2308_p2), %v1848_v48, 5 }
 0x814   : > { %v1561_v51 = vmul.f32 %v1560_v50, %v1560_v50 }
 0x816   : > { %v1562_v52 = vsel %vm1110_vm2, %v1561_v51, 0.0 }
 0x817   : > { %1563 = vadd.xlane.f32.xlu0 %v1562_v52 }
 0x8a4   : > { %v1564_v21 = vpop.xlane.xlu0 %1563 }
 0x8a5   : > { %v1565_v55 = vmul.f32 0.03125, %v1564_v21 }
 0x8a7   : > { %v1566_v56 = vadd.f32 1e-12, %v1565_v55  ;;  %v1846_v55 = vld [vmem:[%s3890_s6] sm:$0xff] (!%p2308_p2) }
 0x8a8   : > { %vm1868_vm12 = vcmp.ne.s32.totalorder (!%p2308_p2), %v1846_v55, 4294967196 }
 0x8a9   : > { %2608 = vrsqrt.f32 %v1566_v56  ;;  %v2984_v56 = vmov (!%p2308_p2), 0   ;;  %v2313_v2 = vsel (!%p2308_p2), %vm1868_vm12, 1.0, %v2982_v45 }
 0x8aa   : > { %2614 = vset.pattern.permute.xlu1 (!%p2308_p2), %v2984_v56  ;;  %2615 = vset.pattern.permute.xlu0 (!%p2308_p2), %v2984_v56 }
 0x8ab   : > { %1862 = vperm.xlu1 (!%p2308_p2), %2614, %v1846_v55  }
 0x8b3   : > { %v2609_v57 = vpop.eup %2608 }
 0x8b4   : > { %v1568_v59 = vmul.f32 %v2609_v57, %v1560_v50 }
 0x8b6   : > { %v1575_v61 = vmul.f32 %v2294_v58, %v1568_v59 }
 0x8b8   : > { %v1582_v62 = vadd.f32 %v2295_v60, %v1575_v61 }
 0x8ba   : > { %v1587_v63 = vpack.c.bf16 %v1582_v62, %v1582_v62 }
 0x8bc   : > { %2409 = vmatmul.mubr.msk.bf16.vlgmr.msra.gmra.mrb[16].mxu0 %vm1110_vm2, %v1587_v63 }
 0x8bd   : > { %2425 = vmatpush3.bf16.msra.mxu0 (!%p2308_p2), %v2616_v44  ;;  %2428 = vmatprep.mubr.msk.bf16.mxu0 (!%p2308_p2), %vm2983_vm9, %v2982_v45 }
 0x8be   : > { %2426 = vmatprep.subr.bf16.mxu0 (!%p2308_p2), %v2982_v45 }
 0x8c1   : > { %2427 = vmatpush3.bf16.msra.mxu0 (!%p2308_p2), %v2617_v46 }
 0x92a   : > { %v1863_v61 = vpop.permute.xlu1 (!%p2308_p2), %1862 }
 0x92b   : > { %vm1864_vm11 = vcmp.eq.s32.totalorder (!%p2308_p2), %v1848_v48, %v1863_v61 }
 0x98f   : > { %v1644_v5 = vpop.f32.mrb[16].mxu0 }
 0x990   : > { %v1645_v6 = vadd.f32 %v2296_v4, %v1644_v5  ;;  %v2410_v7 = vpop.f32.mrb[17].mxu0 }
 0x991   : > { %v1647_v8 = vpop.f32.mrb[18].mxu0 }
 0x992   : > { %v1651_v9 = vmul.f32 0.044715, %v1645_v6  ;;  %v2411_v10 = vpop.f32.mrb[19].mxu0  ;;  %v1650_v16 = vmul.f32 0.5, %v1645_v6 }
 0x994   : > { %v1652_v11 = vmul.f32 %v1651_v9, %v1645_v6 }
 0x996   : > { %v1653_v12 = vmul.f32 %v1652_v11, %v1645_v6 }
 0x998   : > { %v1654_v13 = vadd.f32 %v1653_v12, %v1645_v6  ;;  %v1887_v6 = vsel (!%p2308_p2), %vm1872_vm13, %v2313_v2, 0.0 }
 0x99a   : > { %v1655_v14 = vmul.f32 0.7978846, %v1654_v13 }
 0x99c   : > { %2610 = vtanh.f32 %v1655_v14 }
 0x9a6   : > { %v2611_v15 = vpop.eup %2610 }
 0x9a7   : > { %v1657_v18 = vadd.f32 1.0, %v2611_v15 }
 0x9a9   : > { %v1658_v19 = vmul.f32 %v1657_v18, %v1650_v16 }
 0x9ab   : > { %v1667_v17 = vpack.c.bf16 %v1658_v19, %v1658_v19 }
 0x9ad   : > { %2421 = vmatmul.mubr.msk.bf16.vlgmr.msra.gmra.mrb[16].mxu1 %vm1699_vm8, %v1667_v17 }
 0xa80   : > { %v1737_v22 = vpop.f32.mrb[16].mxu1 }
 0xa81   : > { %v1738_v23 = vadd.f32 %v2300_v20, %v1737_v22  ;;  %v2422_v24 = vpop.f32.mrb[17].mxu1 }
 0xa82   : > { %v1740_v25 = vpop.f32.mrb[18].mxu1 }
 0xa83   : > { %v2423_v26 = vpop.f32.mrb[19].mxu1  ;;  %v1743_v27 = vadd.f32 %v1738_v23, %v1582_v62 }
 0xa85   : > { %v1746_v28 = vsel %vm1110_vm2, %v1743_v27, 0.0 }
 0xa86   : > { %1747 = vadd.xlane.f32.xlu0 %v1746_v28 }
 0xb13   : > { %v1748_v29 = vpop.xlane.xlu0 %1747 }
 0xb14   : > { %v1749_v30 = vmul.f32 0.03125, %v1748_v29 }
 0xb16   : > { %v1750_v31 = vsub.f32 %v1743_v27, %v1749_v30 }
 0xb18   : > { %v1751_v32 = vmul.f32 %v1750_v31, %v1750_v31 }
 0xb1a   : > { %v1752_v33 = vsel %vm1110_vm2, %v1751_v32, 0.0 }
 0xb1b   : > { %1753 = vadd.xlane.f32.xlu0 %v1752_v33 }
 0xba8   : > { %v1754_v34 = vpop.xlane.xlu0 %1753 }
 0xba9   : > { %v1755_v35 = vmul.f32 0.03125, %v1754_v34 }
 0xbab   : > { %v1756_v36 = vadd.f32 1e-12, %v1755_v35 }
 0xbad   : > { %2612 = vrsqrt.f32 %v1756_v36 }
 0xbb7   : > { %v2613_v37 = vpop.eup %2612 }
 0xbb8   : > { %v1758_v39 = vmul.f32 %v2613_v37, %v1750_v31  ;;  %1777 = sbr.rel (%p2308_p2) target bundleno = 3893 (0xf35), region = 132 }
 0xbba   : > { %v1765_v42 = vmul.f32 %v2306_v38, %v1758_v39 }
 0xbbc   : > { %v1772_v43 = vadd.f32 %v2307_v40, %v1765_v42 }
 0xbbe   : > { %1773 = vst.msk [vmem:[#allocation2] sm:$0xff] %vm1110_vm2, %v1772_v43  ;;  %v1782_v47 = vpack.c.bf16 (!%p2308_p2), %v1772_v43, %v1772_v43 }
 0xbc0   : > { %2429 = vmatmul.mubr.msk.bf16.vlgmr.msra.gmra.mrb[0].mxu0 %vm1110_vm2, %v1782_v47 }
 0xc93   : > { %v1839_v50 = vpop.f32.mrb[0].mxu0 }
 0xc94   : > { %v1840_v51 = vadd.f32 %v2309_v49, %v1839_v50  ;;  %v2430_v52 = vpop.f32.mrb[1].mxu0 }
 0xc95   : > { %v1842_v53 = vpop.f32.mrb[2].mxu0 }
 0xc96   : > { %1845 = vst [vmem:[%s982_s15] sm:$0xff] %v1840_v51  ;;  %v2431_v54 = vpop.f32.mrb[3].mxu0  ;;  %v1850_v21 = vsel %vm1849_vm10, %v1840_v51, -1e+30 }
 0xc97   : > { %1851 = vmax.xlane.f32.xlu0 %v1850_v21 }
 0xd24   : > { %v1852_v41 = vpop.xlane.xlu0 %1851 }
 0xd25   : > { %v1853_v57 = vsub.f32 %v1850_v21, %v1852_v41 }
 0xd27   : > { %v1854_v58 = vmul.f32 1.442695, %v1853_v57 }
 0xd29   : > { %2618 = vpow2.f32 %v1854_v58 }
 0xd33   : > { %v2619_v59 = vpop.eup %2618 }
 0xd34   : > { %1856 = vadd.xlane.f32.xlu0 %v2619_v59 }
 0xdc1   : > { %v1857_v60 = vpop.xlane.xlu0 %1856 }
 0xdc2   : > { %2620 = vlog2.f32 %v1857_v60 }
 0xdcc   : > { %v2621_v62 = vpop.eup %2620 }
 0xdcd   : > { %v1859_v63 = vmul.f32 0.6931472, %v2621_v62 }
 0xdcf   : > { %v1860_v0 = vsub.f32 %v1853_v57, %v1859_v63 }
 0xdd1   : > { %v1865_v1 = vsel %vm1864_vm11, %v1860_v0, 0.0 }
 0xdd2   : > { %1866 = vadd.xlane.f32.xlu1 %v1865_v1 }
 0xe5f   : > { %v1867_v3 = vpop.xlane.xlu1 %1866 }
 0xe60   : > { %v1871_v4 = vmul.f32 %v2313_v2, %v1867_v3 }
 0xe62   : > { %v1873_v5 = vsel %vm1872_vm13, %v1871_v4, 0.0 }
 0xe63   : > { %1874 = vadd.xlane.f32.xlu0 %v1873_v5 }
 0xe67   : > { %1888 = vadd.xlane.f32.xlu0 %v1887_v6 }
 0xef0   : > { %v1875_v7 = vpop.xlane.xlu0 %1874 }
 0xef1   : > { %v1876_v8 = vrot.slane %v1875_v7, 4 }
 0xef3   : > { %v1877_v9 = vadd.f32 %v1876_v8, %v1875_v7 }
 0xef4   : > { %v1889_v10 = vpop.xlane.xlu0 %1888 }
 0xef5   : > { %v1878_v11 = vrot.slane %v1877_v9, 2  ;;  %v1890_v12 = vrot.slane %v1889_v10, 4 }
 0xef7   : > { %v1891_v13 = vadd.f32 %v1890_v12, %v1889_v10  ;;  %v1879_v14 = vadd.f32 %v1878_v11, %v1877_v9 }
 0xef9   : > { %v1892_v15 = vrot.slane %v1891_v13, 2  ;;  %v1880_v16 = vrot.slane %v1879_v14, 1 }
 0xefb   : > { %v1893_v18 = vadd.f32 %v1892_v15, %v1891_v13  ;;  %v1881_v19 = vadd.f32 %v1880_v16, %v1879_v14 }
 0xefd   : > { %2432 = vpush %v1881_v19  ;;  %v1894_v17 = vrot.slane %v1893_v18, 1 }
 0xeff   : > { %v1895_v20 = vadd.f32 %v1894_v17, %v1893_v18 }
 0xf01   : > { %2434 = vpush %v1895_v20 }
 0xf2e   : > { %s2433_s13 = spop %2432 }
 0xf2f   : > { %s1883_s22 = ssub.f32 0.0, %s2433_s13 }
 0xf31   : > { %v1884_v22 = vstv %s1883_s22 }
 0xf32   : > { %1886 = vst.msk [vmem:[%s1030_s11] sm:$0x1] %vm1885_vm14, %v1884_v22  ;;  %s2435_s16 = spop %2434 }
 0xf33   : > { %v1897_v23 = vstv %s2435_s16 }
 0xf34   : > { %1898 = vst.msk [vmem:[%s1033_s4] sm:$0x1] %vm1885_vm14, %v1897_v23 }
 0xf35 PF: > { %s3894_s2 = sld [smem:[#allocation27_spill]]  ;;  %s3895_s12 = sld [smem:[#allocation22_spill]] }
 0xf36   : > { %s3896_s3 = sld [smem:[#allocation34_spill]]  ;;  %s3897_s29 = sld [smem:[#allocation59_spill]] }
 0xf37   : > { %s1919_s11 = sshll.u32 %s982_s15, 4  ;;  %s2985_s26 = smov [#allocation15]   ;;  %s1920_s11 = int_to_ptr.vmem [resolvable:$true] %s1919_s11 }
 0xf38   : > { %s2830_s28 = scalar_lea.vmem %s1920_s11, 128  ;;  %s2834_s4 = sshll.u32 %s2985_s26, 4  ;;  %s2835_s4 = int_to_ptr.vmem [resolvable:$false] %s2834_s4 }
 0xf39   : > { %p2831_p0 = scmp.ne.s32.totalorder %s1920_s11, %s2830_s28  ;;  %s2836_s6 = scalar_lea.vmem %s2835_s4, 256 }
 0xf3a   : > { %p2837_p5 = scmp.lt.s32.totalorder %s1920_s11, %s2835_s4  ;;  %p2838_p7 = scmp.lt.s32.totalorder %s2836_s6, %s2830_s28 }
 0xf3b   : > { %s2315_s8 = sshll.u32 %s3894_s2, 7  ;;  %s3899_s5 = sand.u32 1, %s3895_s12  }
 0xf3c   : > { %s3898_s1 = smov %s3897_s29  ;;  %s3674_s25 = scalar_lea.hbm %s3897_s29, %s2315_s8 }
 0xf3d   : > { %s1900_s27 = scalar_lea.sflag [#allocation5], %s3899_s5  ;;  %p3900_p4 = scmp.ne.s32.totalorder %s3896_s3, 0 }
 0xf3e   : > { %p2839_p10 = por %p2838_p7, %p2837_p5 }
 0xf3f   : > { %p2832_p1 = pnand %p2831_p0, %p3900_p4 }
 0xf41   : > { %p2833_p13 = pneg %p2832_p1 }
 0xf43   : > { %p2840_p3 = pnand %p2839_p10, %p2833_p13 }
 0xf45   : > { %2843 = shalt.err (!%p2840_p3)
}
 0xf46   : > { %s2844_s0 = scalar_lea.hbm %s3674_s25, 128  ;;  %s2848_s7 = scalar_lea.hbm %s3898_s1, 256 }
 0xf47   : > { %p2845_p12 = scmp.ne.s32.totalorder %s3674_s25, %s2844_s0  ;;  %p2849_p6 = scmp.lt.u32.totalorder %s3674_s25, %s3898_s1 }
 0xf48   : > { %p2850_p8 = scmp.lt.u32.totalorder %s2848_s7, %s2844_s0  ;;  %p2852_p0 = scmp.lt.u32.totalorder %s2844_s0, %s3674_s25 }
 0xf49   : > { %p2846_p11 = pnand %p2845_p12, %p3900_p4 }
 0xf4a   : > { %p2851_p2 = por %p2850_p8, %p2849_p6 }
 0xf4b   : > { %p2847_p9 = pneg %p2846_p11 }
 0xf4c   : > { %p2853_p1 = por %p2852_p0, %p2851_p2 }
 0xf4e   : > { %p2854_p13 = pnand %p2853_p1, %p2847_p9 }
 0xf50   : > { %2857 = shalt.err (!%p2854_p13)
}
 0xf51   : > { %2452 = dma.vmem_to_hbm [thread:$0]  (%p3900_p4), %s1920_s11, 128, %s3674_s25, %s1900_s27  }
 0xf52 PF: > { %s3901_s22 = sld [smem:[#allocation30_spill]]  ;;  %s3902_s18 = sld [smem:[#allocation21_spill]] }
 0xf53   : > { %s3903_s19 = sld [smem:[#allocation35_spill]] }
 0xf58   : > { %p2484_p5 = scmp.ge.s32.totalorder %s3901_s22, 2  ;;  %s1937_s9 = sand.u32 1, %s3902_s18  }
 0xf59   : > { %p3904_p7 = scmp.ne.s32.totalorder %s3903_s19, 0  ;;  %s1938_s16 = scalar_lea.sflag [#allocation5], %s1937_s9 }
 0xf5b   : > { %p2478_p10 = pnand %p2484_p5, %p3904_p7 }
 0xf5d   : > { %2919 = dma.done.wait (!%p2478_p10), %s1938_s16, 128  }
 0xf5e   : > { %2921 = vsyncadd (!%p2478_p10), %s1938_s16, 4294967168  ;;  %s45_s5 = sadd.s32 1, %s3901_s22   ;;  %s3905_s2 = sld [smem:[#allocation22_spill]] }
 0xf5f   : > { %p42_p3 = scmp.ge.s32.totalorder %s45_s5, 6   ;;  %s3906_s25 = sld [smem:[#allocation23_spill]] }
 0xf60   : > { %s3907_s26 = sld [smem:[#allocation36_spill]]  ;;  %s3908_s27 = sld [smem:[#allocation24_spill]] }
 0xf61   : > { %s3909_s3 = sld [smem:[#allocation25_spill]]  ;;  %s3910_s28 = sld [smem:[#allocation32_spill]] }
 0xf62   : > { %s3911_s29 = sld [smem:[#allocation28_spill]]  ;;  %s3912_s0 = sld [smem:[#allocation29_spill]] }
 0xf63   : > { %s3913_s4 = sld [smem:[#allocation31_spill]]  ;;  %s3914_s30 = sld [smem:[#allocation33_spill]] }
 0xf64   :  { %44 = sbr.rel (!%p42_p3) target bundleno = 37 (0x25), region = 264 }
 0xf6b   :  { %1955 = vsyncpa [#allocation4], 1 }
 0xf6c   :  { %1957 = vsyncpa [#allocation4 + $0x1], 1 }
 0xf6d   :  { %1958 = vsyncpa [#allocation7], 1 }
 0xf6e   :  { %1960 = vsyncpa [#allocation7 + $0x1], 1 }
 0xf6f   :  { %1961 = vsyncpa [#allocation10], 1 }
 0xf70   :  { %1963 = vsyncpa [#allocation10 + $0x1], 1 }
 0xf71   :  { %1964 = vsyncpa [#allocation13], 1 }
 0xf72   :  { %1966 = vsyncpa [#allocation13 + $0x1], 1 }
 0xf73   :  { %1967 = vsyncpa [#allocation5], 1 }
 0xf74   :  { %1969 = vsyncpa [#allocation5 + $0x1], 1 }

</bundles_post_ra>
